<compile_context>
chip_gen: v6e
topology: v6e:2x2x1
jax: 0.10.0
libtpu: 0.0.40
codegen_flags: <defaults>
</compile_context>

<pallas_src>
import functools

import jax
import jax.numpy as jnp
from jax.experimental import pallas as pl
from jax.experimental.pallas import tpu as pltpu


def _round_up(v: int, m: int) -> int:
    return ((v + m - 1) // m) * m


def _pick_sae_chunk(d_sae: int, target: int) -> int:
    if d_sae <= target:
        return d_sae
    for c in (target, 512, 256, 128):
        if c <= target and d_sae % c == 0:
            return c
    return d_sae  # fall back to a single full-width chunk


def _sae_kernel(k, k_pad, n_chunks, ts, tm, n_valid, param_dtype,
                x_ref, w_enc_ref, b_enc_ref, w_dec_ref, b_dec_ref,
                sae_out_ref, top_acts_ref, top_idx_ref, stats_ref,
                topv_ref, topi_ref, acc_ref):
    i = pl.program_id(0)          # token-tile index ("parallel")
    j = pl.program_id(1)          # phased d_sae chunk index ("arbitrary")

    neg_inf = jnp.float32(-jnp.inf)
    big_idx = jnp.int32(2 ** 30)

    # ---- init per-token-tile state ----
    @pl.when(j == 0)
    def _init():
        topv_ref[...] = jnp.full((tm, k_pad), neg_inf, jnp.float32)
        topi_ref[...] = jnp.full((tm, k_pad), -1, jnp.int32)
        acc_ref[...] = jnp.zeros_like(acc_ref)

    # ---- phase 1: encode this d_sae chunk + merge into running top-k ----
    @pl.when(j < n_chunks)
    def _encode():
        x = x_ref[...].astype(jnp.float32)                     # (tm, d_in)
        b_dec = b_dec_ref[...].astype(jnp.float32)             # (1, d_in)
        sae_in = (x - b_dec).astype(param_dtype)
        # (x - b_dec) @ W_enc_chunk.T  (contract on d_in of both operands).
        pre = jax.lax.dot_general(
            sae_in, w_enc_ref[...],
            dimension_numbers=(((1,), (1,)), ((), ())),
            preferred_element_type=jnp.float32)
        pre = pre + b_enc_ref[...].astype(jnp.float32)
        latent = jnp.maximum(pre, 0.0)                         # (tm, ts), >= 0

        col = jax.lax.broadcasted_iota(jnp.int32, (tm, ts), 1) + j * ts

        # chunk-local top-k: k exact rounds (max + lowest-index tie break).
        work = latent
        cv, ci = [], []
        for _ in range(k):
            m = jnp.max(work, axis=-1, keepdims=True)
            idx = jnp.min(jnp.where(work == m, col, big_idx),
                          axis=-1, keepdims=True)
            cv.append(m)
            ci.append(idx)
            work = jnp.where(col == idx, neg_inf, work)
        chunk_v = jnp.concatenate(cv, axis=-1)                 # (tm, k)
        chunk_i = jnp.concatenate(ci, axis=-1)

        # merge with running state: top-k of 2k candidates (indices are unique).
        state_v = topv_ref[...]
        state_i = topi_ref[...]
        comb_v = jnp.concatenate([state_v[:, :k], chunk_v], axis=-1)   # (tm, 2k)
        comb_i = jnp.concatenate([state_i[:, :k], chunk_i], axis=-1)
        wv = comb_v
        nv, ni = [], []
        for _ in range(k):
            m = jnp.max(wv, axis=-1, keepdims=True)
            idx = jnp.min(jnp.where(wv == m, comb_i, big_idx),
                          axis=-1, keepdims=True)
            nv.append(m)
            ni.append(idx)
            wv = jnp.where(comb_i == idx, neg_inf, wv)
        new_v = jnp.concatenate(nv, axis=-1)                   # (tm, k)
        new_i = jnp.concatenate(ni, axis=-1)
        if k_pad > k:  # keep the scratch / output lane-dense (one full-width store)
            new_v = jnp.concatenate(
                [new_v, jnp.full((tm, k_pad - k), neg_inf, jnp.float32)], axis=-1)
            new_i = jnp.concatenate(
                [new_i, jnp.full((tm, k_pad - k), -1, jnp.int32)], axis=-1)
        topv_ref[...] = new_v
        topi_ref[...] = new_i

    # ---- phase 2: streamed decode of the selected latents ----
    @pl.when(j >= n_chunks)
    def _decode():
        jj = j - n_chunks
        col = jax.lax.broadcasted_iota(jnp.int32, (tm, ts), 1) + jj * ts
        state_v = topv_ref[...]
        state_i = topi_ref[...]
        # scatter selected (value, index) pairs falling in this chunk -> dense block
        dense = jnp.zeros((tm, ts), jnp.float32)
        for t in range(k):
            v = state_v[:, t:t + 1]                            # (tm, 1)
            idx = state_i[:, t:t + 1]
            dense = dense + jnp.where(col == idx, v, 0.0)
        acc_ref[...] += jnp.dot(dense.astype(param_dtype), w_dec_ref[...],
                                preferred_element_type=jnp.float32)

    # ---- finalize this token tile ----
    @pl.when(j == 2 * n_chunks - 1)
    def _finalize():
        x = x_ref[...].astype(jnp.float32)
        b_dec = b_dec_ref[...].astype(jnp.float32)
        sae_out = acc_ref[...] + b_dec
        sae_out_ref[...] = sae_out.astype(sae_out_ref.dtype)
        top_acts_ref[...] = topv_ref[...]
        top_idx_ref[...] = topi_ref[...]

        # streaming fvu statistics: per-feature partial sums over this token tile
        d_in = x.shape[1]
        row = jax.lax.broadcasted_iota(jnp.int32, (tm, 1), 0) + i * tm
        valid = (row < n_valid).astype(jnp.float32)            # mask padded rows
        e = (sae_out - x) * valid
        xv = x * valid
        sum_e2 = jnp.sum(e * e, axis=0, keepdims=True)         # (1, d_in)
        sum_x = jnp.sum(xv, axis=0, keepdims=True)
        sum_x2 = jnp.sum(xv * xv, axis=0, keepdims=True)
        pad = jnp.zeros((5, d_in), jnp.float32)
        stats_ref[...] = jnp.concatenate([sum_e2, sum_x, sum_x2, pad],
                                         axis=0)[None]


def sae_forward(x, w_enc, b_enc, w_dec, b_dec, k,
                *, token_tile=256, sae_chunk=512):
    """Fused Sae.forward(x) with dead_mask=None.

    Returns (sae_out, latent_acts (top-k), latent_indices, fvu, auxk_loss).
    """
    d_in = x.shape[-1]
    d_sae = w_enc.shape[0]
    assert w_enc.shape == (d_sae, d_in) and w_dec.shape == (d_sae, d_in)
    param_dtype = w_enc.dtype

    xf = x.reshape(-1, d_in).astype(jnp.float32)
    n = xf.shape[0]

    tm = min(token_tile, _round_up(n, 8))
    n_pad = _round_up(n, tm)
    if n_pad != n:
        xf = jnp.pad(xf, ((0, n_pad - n), (0, 0)))
    n_tiles = n_pad // tm

    ts = _pick_sae_chunk(d_sae, sae_chunk)
    n_chunks = d_sae // ts
    assert k <= ts, "k must not exceed the d_sae chunk size"
    k_pad = _round_up(k, 128)        # lane-dense top-k outputs

    grid = (n_tiles, 2 * n_chunks)

    b_enc2 = b_enc.reshape(1, d_sae)
    b_dec2 = b_dec.reshape(1, d_in)

    kernel = functools.partial(
        _sae_kernel, k, k_pad, n_chunks, ts, tm, n, param_dtype)

    # Encode phase streams W_enc chunks; decode phase streams W_dec chunks.
    # (Index maps clamp so the unused operand's block does not change -> no re-DMA.)
    enc_blk = lambda i, j: (jnp.minimum(j, n_chunks - 1), 0)
    benc_blk = lambda i, j: (0, jnp.minimum(j, n_chunks - 1))
    dec_blk = lambda i, j: (jnp.maximum(j - n_chunks, 0), 0)

    in_specs = [
        pl.BlockSpec((tm, d_in), lambda i, j: (i, 0)),        # x tile (f32, resident per i)
        pl.BlockSpec((ts, d_in), enc_blk),                    # W_enc chunk (param dtype)
        pl.BlockSpec((1, ts), benc_blk),                      # b_enc chunk
        pl.BlockSpec((ts, d_in), dec_blk),                    # W_dec chunk (param dtype)
        pl.BlockSpec((1, d_in), lambda i, j: (0, 0)),         # b_dec
    ]
    out_specs = (
        pl.BlockSpec((tm, d_in), lambda i, j: (i, 0)),        # sae_out
        pl.BlockSpec((tm, k_pad), lambda i, j: (i, 0)),       # top_acts (lane-padded)
        pl.BlockSpec((tm, k_pad), lambda i, j: (i, 0)),       # top_idx  (lane-padded)
        pl.BlockSpec((1, 8, d_in), lambda i, j: (i, 0, 0)),   # fvu partial sums
    )
    out_shape = (
        jax.ShapeDtypeStruct((n_pad, d_in), jnp.float32),
        jax.ShapeDtypeStruct((n_pad, k_pad), jnp.float32),
        jax.ShapeDtypeStruct((n_pad, k_pad), jnp.int32),
        jax.ShapeDtypeStruct((n_tiles, 8, d_in), jnp.float32),
    )
    scratch_shapes = [
        pltpu.VMEM((tm, k_pad), jnp.float32),   # running top-k values
        pltpu.VMEM((tm, k_pad), jnp.int32),     # running top-k indices
        pltpu.VMEM((tm, d_in), jnp.float32),    # decode accumulator
    ]

    itm = jnp.dtype(param_dtype).itemsize
    # Rough per-step VMEM footprint (streamed weight chunks are double-buffered).
    vmem_est = (4 * ts * d_in * itm            # W_enc + W_dec chunks, 2 buffers each
                + 2 * ts * itm                 # b_enc chunk
                + 2 * tm * d_in * 4            # x tile
                + 2 * tm * d_in * 4            # sae_out
                + 4 * tm * k_pad * 8           # top-k outputs
                + 2 * 8 * d_in * 4             # stats
                + tm * d_in * 4                # accumulator scratch
                + tm * k_pad * 8)              # top-k scratch
    vmem_limit = int(min(max(2 * vmem_est, 16 * 1024 * 1024), 64 * 1024 * 1024))

    cost = pl.CostEstimate(
        flops=int(4 * n_pad * d_sae * d_in),   # encode + decode matmuls
        transcendentals=0,
        bytes_accessed=int(n_tiles * 2 * d_sae * d_in * itm
                           + 2 * n_pad * d_in * 4 + n_pad * k_pad * 8),
    )

    sae_out, top_acts, top_idx, stats = pl.pallas_call(
        kernel,
        grid=grid,
        in_specs=in_specs,
        out_specs=out_specs,
        out_shape=out_shape,
        scratch_shapes=scratch_shapes,
        compiler_params=pltpu.CompilerParams(
            dimension_semantics=("parallel", "arbitrary"),
            vmem_limit_bytes=vmem_limit),
        cost_estimate=cost,
    )(xf, w_enc, b_enc2, w_dec, b_dec2)

    sae_out = sae_out[:n]
    top_acts = top_acts[:n, :k]
    top_idx = top_idx[:n, :k]

    # fvu exactly as in the reference forward:
    #   l2_loss = e.pow(2).sum(0); total_variance = (x - x.mean(0)).pow(2).sum(0)
    #   fvu = mean(l2_loss / total_variance)   (mean over d_in of per-feature ratios)
    sum_e2 = jnp.sum(stats[:, 0, :], axis=0)
    sum_x = jnp.sum(stats[:, 1, :], axis=0)
    sum_x2 = jnp.sum(stats[:, 2, :], axis=0)
    total_var = sum_x2 - (sum_x * sum_x) / n
    fvu = jnp.mean(sum_e2 / total_var)

    auxk_loss = jnp.float32(0.0)   # dead_mask is None in this forward
    return sae_out, top_acts, top_idx, fvu, auxk_loss


def init_params(key, d_in, expansion_factor, dtype=jnp.float32):
    """Deterministic params mirroring Sae.__init__ (normalize_decoder=True)."""
    d_sae = d_in * expansion_factor
    bound = 1.0 / (d_in ** 0.5)                 # nn.Linear default init bound
    w_enc = jax.random.uniform(key, (d_sae, d_in), jnp.float32,
                               minval=-bound, maxval=bound) * 0.1
    b_enc = jnp.zeros((d_sae,), jnp.float32)
    w_dec = w_enc
    norm = jnp.linalg.norm(w_dec, axis=1, keepdims=True)
    w_dec = w_dec / (norm + jnp.finfo(jnp.float32).eps)   # unit-norm decoder rows
    return (w_enc.astype(dtype), b_enc.astype(dtype),
            w_dec.astype(dtype), jnp.zeros((d_in,), dtype))


if __name__ == "__main__":
    batch, seq, d_in = 2, 8, 128
    expansion_factor, k = 4, 4                  # d_sae = 512
    d_sae = d_in * expansion_factor

    key = jax.random.PRNGKey(0)
    kx, kw = jax.random.split(key)
    x = jax.random.normal(kx, (batch, seq, d_in), jnp.float32)
    # bfloat16 parameters (module dtype) -> bf16 MXU operands with f32 accumulation.
    w_enc, b_enc, w_dec, b_dec = init_params(kw, d_in, expansion_factor,
                                             dtype=jnp.bfloat16)

    fwd = jax.jit(functools.partial(sae_forward, k=k, token_tile=256,
                                    sae_chunk=256))
    sae_out, top_acts, top_idx, fvu, auxk = fwd(x, w_enc, b_enc, w_dec, b_dec)
    jax.block_until_ready((sae_out, top_acts, top_idx, fvu, auxk))

    n = batch * seq
    assert sae_out.shape == (n, d_in)
    assert top_acts.shape == (n, k)
    assert top_idx.shape == (n, k)
    assert fvu.shape == ()
    assert bool(jnp.isfinite(fvu))
    assert bool(jnp.all((top_idx >= 0) & (top_idx < d_sae)))
    assert bool(jnp.all(top_acts >= 0.0))
    print("KERNEL_OK")
</pallas_src>

<mosaic_0001>
module attributes {stable_mosaic.version = 11 : i64} {
  func.func @_sae_kernel(%arg0: i32, %arg1: i32, %arg2: memref<16x128xf32, #tpu.memory_space<vmem>>, %arg3: memref<256x128xbf16, #tpu.memory_space<vmem>>, %arg4: memref<1x256xbf16, #tpu.memory_space<vmem>>, %arg5: memref<256x128xbf16, #tpu.memory_space<vmem>>, %arg6: memref<1x128xbf16, #tpu.memory_space<vmem>>, %arg7: memref<16x128xf32, #tpu.memory_space<vmem>>, %arg8: memref<16x128xf32, #tpu.memory_space<vmem>>, %arg9: memref<16x128xi32, #tpu.memory_space<vmem>>, %arg10: memref<1x8x128xf32, #tpu.memory_space<vmem>>, %arg11: memref<16x128xf32, #tpu.memory_space<vmem>>, %arg12: memref<16x128xi32, #tpu.memory_space<vmem>>, %arg13: memref<16x128xf32, #tpu.memory_space<vmem>>) attributes {dimension_semantics = [#tpu.dimension_semantics<parallel>, #tpu.dimension_semantics<arbitrary>], iteration_bounds = array<i64: 1, 4>, scalar_prefetch = 0 : i64, scratch_operands = 3 : i64, tpu.core_type = #tpu.core_type<tc>, window_params = [{transform_indices = @transform_0, window_bounds = array<i64: 16, 128>}, {transform_indices = @transform_1, window_bounds = array<i64: 256, 128>}, {transform_indices = @transform_2, window_bounds = array<i64: 1, 256>}, {transform_indices = @transform_3, window_bounds = array<i64: 256, 128>}, {pipeline_mode = #tpu.pipeline_mode<synchronous>, transform_indices = @transform_4, window_bounds = array<i64: 1, 128>}, {transform_indices = @transform_5, window_bounds = array<i64: 16, 128>}, {transform_indices = @transform_6, window_bounds = array<i64: 16, 128>}, {transform_indices = @transform_7, window_bounds = array<i64: 16, 128>}, {transform_indices = @transform_8, window_bounds = array<i64: 1, 8, 128>}]} {
    %c0_i32 = arith.constant 0 : i32
    %0 = arith.cmpi eq, %arg1, %c0_i32 : i32
    %1 = arith.extui %0 : i1 to i32
    %cst = arith.constant 0xFF800000 : f32
    %c0_i32_0 = arith.constant 0 : i32
    %2 = arith.cmpi ne, %1, %c0_i32_0 : i32
    scf.if %2 {
      %12 = vector.broadcast %cst : f32 to vector<16x128xf32>
      %c0 = arith.constant 0 : index
      %c0_6 = arith.constant 0 : index
      %13 = vector.load %arg11[%c0, %c0_6] : memref<16x128xf32, #tpu.memory_space<vmem>>, vector<16x128xf32>
      tpu.vector_store %arg11[%c0, %c0_6], %12 {strides = array<i32>} : memref<16x128xf32, #tpu.memory_space<vmem>>, vector<16x128xf32>,
      %c-1_i32 = arith.constant -1 : i32
      %14 = vector.broadcast %c-1_i32 : i32 to vector<16x128xi32>
      %c0_7 = arith.constant 0 : index
      %c0_8 = arith.constant 0 : index
      %15 = vector.load %arg12[%c0_7, %c0_8] : memref<16x128xi32, #tpu.memory_space<vmem>>, vector<16x128xi32>
      tpu.vector_store %arg12[%c0_7, %c0_8], %14 {strides = array<i32>} : memref<16x128xi32, #tpu.memory_space<vmem>>, vector<16x128xi32>,
      %cst_9 = arith.constant 0.000000e+00 : f32
      %16 = vector.broadcast %cst_9 : f32 to vector<16x128xf32>
      %c0_10 = arith.constant 0 : index
      %c0_11 = arith.constant 0 : index
      %17 = vector.load %arg13[%c0_10, %c0_11] : memref<16x128xf32, #tpu.memory_space<vmem>>, vector<16x128xf32>
      tpu.vector_store %arg13[%c0_10, %c0_11], %16 {strides = array<i32>} : memref<16x128xf32, #tpu.memory_space<vmem>>, vector<16x128xf32>,
    } else {
    }
    %c2_i32 = arith.constant 2 : i32
    %3 = arith.cmpi slt, %arg1, %c2_i32 : i32
    %4 = arith.extui %3 : i1 to i32
    %c1073741824_i32 = arith.constant 1073741824 : i32
    %cst_1 = arith.constant 0xFF800000 : f32
    %c0_i32_2 = arith.constant 0 : i32
    %5 = arith.cmpi ne, %4, %c0_i32_2 : i32
    scf.if %5 {
      %c0 = arith.constant 0 : index
      %c0_6 = arith.constant 0 : index
      %12 = vector.load %arg2[%c0, %c0_6] : memref<16x128xf32, #tpu.memory_space<vmem>>, vector<16x128xf32>
      %c0_7 = arith.constant 0 : index
      %c0_8 = arith.constant 0 : index
      %13 = vector.load %arg6[%c0_7, %c0_8] : memref<1x128xbf16, #tpu.memory_space<vmem>>, vector<1x128xbf16>
      %14 = arith.extf %13 : vector<1x128xbf16> to vector<1x128xf32>
      %15 = vector.broadcast %14 : vector<1x128xf32> to vector<16x128xf32>
      %16 = arith.subf %12, %15 : vector<16x128xf32>
      %17 = arith.truncf %16 : vector<16x128xf32> to vector<16x128xbf16>
      %c0_9 = arith.constant 0 : index
      %c0_10 = arith.constant 0 : index
      %18 = vector.load %arg3[%c0_9, %c0_10] : memref<256x128xbf16, #tpu.memory_space<vmem>>, vector<256x128xbf16>
      %cst_11 = arith.constant dense<0.000000e+00> : vector<16x256xf32>
      %19 = tpu.matmul %17, %18, %cst_11 {dimension_numbers = #tpu.dot_dimension_numbers<[1], [1], [0], [0], [0, 0, 1, 0], [], []>} : vector<16x128xbf16>, vector<256x128xbf16>, vector<16x256xf32> -> vector<16x256xf32>
      %c0_12 = arith.constant 0 : index
      %c0_13 = arith.constant 0 : index
      %20 = vector.load %arg4[%c0_12, %c0_13] : memref<1x256xbf16, #tpu.memory_space<vmem>>, vector<1x256xbf16>
      %21 = arith.extf %20 : vector<1x256xbf16> to vector<1x256xf32>
      %22 = vector.broadcast %21 : vector<1x256xf32> to vector<16x256xf32>
      %23 = arith.addf %19, %22 : vector<16x256xf32>
      %cst_14 = arith.constant 0.000000e+00 : f32
      %24 = vector.broadcast %cst_14 : f32 to vector<16x256xf32>
      %25 = arith.maximumf %23, %24 : vector<16x256xf32>
      %26 = tpu.iota {dimensions = array<i32: 1>} : vector<16x256xi32>
      %c256_i32 = arith.constant 256 : i32
      %27 = arith.muli %arg1, %c256_i32 : i32
      %28 = vector.broadcast %27 : i32 to vector<16x256xi32>
      %29 = arith.addi %26, %28 : vector<16x256xi32>
      %cst_15 = arith.constant dense<0xFF800000> : vector<16xf32>
      %30 = vector.multi_reduction <maximumf>, %25, %cst_15 [1] : vector<16x256xf32> to vector<16xf32>
      %31 = vector.shape_cast %30 : vector<16xf32> to vector<16x1xf32>
      %32 = vector.broadcast %31 : vector<16x1xf32> to vector<16x256xf32>
      %33 = arith.cmpf oeq, %25, %32 : vector<16x256xf32>
      %34 = vector.broadcast %c1073741824_i32 : i32 to vector<16x256xi32>
      %35 = arith.select %33, %29, %34 : vector<16x256xi1>, vector<16x256xi32>
      %cst_16 = arith.constant dense<2147483647> : vector<16xi32>
      %36 = vector.multi_reduction <minsi>, %35, %cst_16 [1] : vector<16x256xi32> to vector<16xi32>
      %37 = vector.shape_cast %36 : vector<16xi32> to vector<16x1xi32>
      %38 = vector.broadcast %37 : vector<16x1xi32> to vector<16x256xi32>
      %39 = arith.cmpi eq, %29, %38 : vector<16x256xi32>
      %40 = vector.broadcast %cst_1 : f32 to vector<16x256xf32>
      %41 = arith.select %39, %40, %25 : vector<16x256xi1>, vector<16x256xf32>
      %cst_17 = arith.constant dense<0xFF800000> : vector<16xf32>
      %42 = vector.multi_reduction <maximumf>, %41, %cst_17 [1] : vector<16x256xf32> to vector<16xf32>
      %43 = vector.shape_cast %42 : vector<16xf32> to vector<16x1xf32>
      %44 = vector.broadcast %43 : vector<16x1xf32> to vector<16x256xf32>
      %45 = arith.cmpf oeq, %41, %44 : vector<16x256xf32>
      %46 = vector.broadcast %c1073741824_i32 : i32 to vector<16x256xi32>
      %47 = arith.select %45, %29, %46 : vector<16x256xi1>, vector<16x256xi32>
      %cst_18 = arith.constant dense<2147483647> : vector<16xi32>
      %48 = vector.multi_reduction <minsi>, %47, %cst_18 [1] : vector<16x256xi32> to vector<16xi32>
      %49 = vector.shape_cast %48 : vector<16xi32> to vector<16x1xi32>
      %50 = vector.broadcast %49 : vector<16x1xi32> to vector<16x256xi32>
      %51 = arith.cmpi eq, %29, %50 : vector<16x256xi32>
      %52 = vector.broadcast %cst_1 : f32 to vector<16x256xf32>
      %53 = arith.select %51, %52, %41 : vector<16x256xi1>, vector<16x256xf32>
      %cst_19 = arith.constant dense<0xFF800000> : vector<16xf32>
      %54 = vector.multi_reduction <maximumf>, %53, %cst_19 [1] : vector<16x256xf32> to vector<16xf32>
      %55 = vector.shape_cast %54 : vector<16xf32> to vector<16x1xf32>
      %56 = vector.broadcast %55 : vector<16x1xf32> to vector<16x256xf32>
      %57 = arith.cmpf oeq, %53, %56 : vector<16x256xf32>
      %58 = vector.broadcast %c1073741824_i32 : i32 to vector<16x256xi32>
      %59 = arith.select %57, %29, %58 : vector<16x256xi1>, vector<16x256xi32>
      %cst_20 = arith.constant dense<2147483647> : vector<16xi32>
      %60 = vector.multi_reduction <minsi>, %59, %cst_20 [1] : vector<16x256xi32> to vector<16xi32>
      %61 = vector.shape_cast %60 : vector<16xi32> to vector<16x1xi32>
      %62 = vector.broadcast %61 : vector<16x1xi32> to vector<16x256xi32>
      %63 = arith.cmpi eq, %29, %62 : vector<16x256xi32>
      %64 = vector.broadcast %cst_1 : f32 to vector<16x256xf32>
      %65 = arith.select %63, %64, %53 : vector<16x256xi1>, vector<16x256xf32>
      %cst_21 = arith.constant dense<0xFF800000> : vector<16xf32>
      %66 = vector.multi_reduction <maximumf>, %65, %cst_21 [1] : vector<16x256xf32> to vector<16xf32>
      %67 = vector.shape_cast %66 : vector<16xf32> to vector<16x1xf32>
      %68 = vector.broadcast %67 : vector<16x1xf32> to vector<16x256xf32>
      %69 = arith.cmpf oeq, %65, %68 : vector<16x256xf32>
      %70 = vector.broadcast %c1073741824_i32 : i32 to vector<16x256xi32>
      %71 = arith.select %69, %29, %70 : vector<16x256xi1>, vector<16x256xi32>
      %cst_22 = arith.constant dense<2147483647> : vector<16xi32>
      %72 = vector.multi_reduction <minsi>, %71, %cst_22 [1] : vector<16x256xi32> to vector<16xi32>
      %73 = vector.shape_cast %72 : vector<16xi32> to vector<16x1xi32>
      %74 = tpu.concatenate %31, %43, %55, %67 in 1 : vector<16x1xf32>, vector<16x1xf32>, vector<16x1xf32>, vector<16x1xf32> -> vector<16x4xf32>
      %75 = tpu.concatenate %37, %49, %61, %73 in 1 : vector<16x1xi32>, vector<16x1xi32>, vector<16x1xi32>, vector<16x1xi32> -> vector<16x4xi32>
      %c0_23 = arith.constant 0 : index
      %c0_24 = arith.constant 0 : index
      %76 = vector.load %arg11[%c0_23, %c0_24] : memref<16x128xf32, #tpu.memory_space<vmem>>, vector<16x128xf32>
      %c0_25 = arith.constant 0 : index
      %c0_26 = arith.constant 0 : index
      %77 = vector.load %arg12[%c0_25, %c0_26] : memref<16x128xi32, #tpu.memory_space<vmem>>, vector<16x128xi32>
      %78 = vector.extract_strided_slice %76 {offsets = [0, 0], sizes = [16, 4], strides = [1, 1]} : vector<16x128xf32> to vector<16x4xf32>
      %79 = tpu.concatenate %78, %74 in 1 : vector<16x4xf32>, vector<16x4xf32> -> vector<16x8xf32>
      %80 = vector.extract_strided_slice %77 {offsets = [0, 0], sizes = [16, 4], strides = [1, 1]} : vector<16x128xi32> to vector<16x4xi32>
      %81 = tpu.concatenate %80, %75 in 1 : vector<16x4xi32>, vector<16x4xi32> -> vector<16x8xi32>
      %cst_27 = arith.constant dense<0xFF800000> : vector<16xf32>
      %82 = vector.multi_reduction <maximumf>, %79, %cst_27 [1] : vector<16x8xf32> to vector<16xf32>
      %83 = vector.shape_cast %82 : vector<16xf32> to vector<16x1xf32>
      %84 = vector.broadcast %83 : vector<16x1xf32> to vector<16x8xf32>
      %85 = arith.cmpf oeq, %79, %84 : vector<16x8xf32>
      %86 = vector.broadcast %c1073741824_i32 : i32 to vector<16x8xi32>
      %87 = arith.select %85, %81, %86 : vector<16x8xi1>, vector<16x8xi32>
      %cst_28 = arith.constant dense<2147483647> : vector<16xi32>
      %88 = vector.multi_reduction <minsi>, %87, %cst_28 [1] : vector<16x8xi32> to vector<16xi32>
      %89 = vector.shape_cast %88 : vector<16xi32> to vector<16x1xi32>
      %90 = vector.broadcast %89 : vector<16x1xi32> to vector<16x8xi32>
      %91 = arith.cmpi eq, %81, %90 : vector<16x8xi32>
      %92 = vector.broadcast %cst_1 : f32 to vector<16x8xf32>
      %93 = arith.select %91, %92, %79 : vector<16x8xi1>, vector<16x8xf32>
      %cst_29 = arith.constant dense<0xFF800000> : vector<16xf32>
      %94 = vector.multi_reduction <maximumf>, %93, %cst_29 [1] : vector<16x8xf32> to vector<16xf32>
      %95 = vector.shape_cast %94 : vector<16xf32> to vector<16x1xf32>
      %96 = vector.broadcast %95 : vector<16x1xf32> to vector<16x8xf32>
      %97 = arith.cmpf oeq, %93, %96 : vector<16x8xf32>
      %98 = vector.broadcast %c1073741824_i32 : i32 to vector<16x8xi32>
      %99 = arith.select %97, %81, %98 : vector<16x8xi1>, vector<16x8xi32>
      %cst_30 = arith.constant dense<2147483647> : vector<16xi32>
      %100 = vector.multi_reduction <minsi>, %99, %cst_30 [1] : vector<16x8xi32> to vector<16xi32>
      %101 = vector.shape_cast %100 : vector<16xi32> to vector<16x1xi32>
      %102 = vector.broadcast %101 : vector<16x1xi32> to vector<16x8xi32>
      %103 = arith.cmpi eq, %81, %102 : vector<16x8xi32>
      %104 = vector.broadcast %cst_1 : f32 to vector<16x8xf32>
      %105 = arith.select %103, %104, %93 : vector<16x8xi1>, vector<16x8xf32>
      %cst_31 = arith.constant dense<0xFF800000> : vector<16xf32>
      %106 = vector.multi_reduction <maximumf>, %105, %cst_31 [1] : vector<16x8xf32> to vector<16xf32>
      %107 = vector.shape_cast %106 : vector<16xf32> to vector<16x1xf32>
      %108 = vector.broadcast %107 : vector<16x1xf32> to vector<16x8xf32>
      %109 = arith.cmpf oeq, %105, %108 : vector<16x8xf32>
      %110 = vector.broadcast %c1073741824_i32 : i32 to vector<16x8xi32>
      %111 = arith.select %109, %81, %110 : vector<16x8xi1>, vector<16x8xi32>
      %cst_32 = arith.constant dense<2147483647> : vector<16xi32>
      %112 = vector.multi_reduction <minsi>, %111, %cst_32 [1] : vector<16x8xi32> to vector<16xi32>
      %113 = vector.shape_cast %112 : vector<16xi32> to vector<16x1xi32>
      %114 = vector.broadcast %113 : vector<16x1xi32> to vector<16x8xi32>
      %115 = arith.cmpi eq, %81, %114 : vector<16x8xi32>
      %116 = vector.broadcast %cst_1 : f32 to vector<16x8xf32>
      %117 = arith.select %115, %116, %105 : vector<16x8xi1>, vector<16x8xf32>
      %cst_33 = arith.constant dense<0xFF800000> : vector<16xf32>
      %118 = vector.multi_reduction <maximumf>, %117, %cst_33 [1] : vector<16x8xf32> to vector<16xf32>
      %119 = vector.shape_cast %118 : vector<16xf32> to vector<16x1xf32>
      %120 = vector.broadcast %119 : vector<16x1xf32> to vector<16x8xf32>
      %121 = arith.cmpf oeq, %117, %120 : vector<16x8xf32>
      %122 = vector.broadcast %c1073741824_i32 : i32 to vector<16x8xi32>
      %123 = arith.select %121, %81, %122 : vector<16x8xi1>, vector<16x8xi32>
      %cst_34 = arith.constant dense<2147483647> : vector<16xi32>
      %124 = vector.multi_reduction <minsi>, %123, %cst_34 [1] : vector<16x8xi32> to vector<16xi32>
      %125 = vector.shape_cast %124 : vector<16xi32> to vector<16x1xi32>
      %126 = tpu.concatenate %83, %95, %107, %119 in 1 : vector<16x1xf32>, vector<16x1xf32>, vector<16x1xf32>, vector<16x1xf32> -> vector<16x4xf32>
      %127 = tpu.concatenate %89, %101, %113, %125 in 1 : vector<16x1xi32>, vector<16x1xi32>, vector<16x1xi32>, vector<16x1xi32> -> vector<16x4xi32>
      %128 = vector.broadcast %cst_1 : f32 to vector<16x124xf32>
      %129 = tpu.concatenate %126, %128 in 1 : vector<16x4xf32>, vector<16x124xf32> -> vector<16x128xf32>
      %c-1_i32 = arith.constant -1 : i32
      %130 = vector.broadcast %c-1_i32 : i32 to vector<16x124xi32>
      %131 = tpu.concatenate %127, %130 in 1 : vector<16x4xi32>, vector<16x124xi32> -> vector<16x128xi32>
      %c0_35 = arith.constant 0 : index
      %c0_36 = arith.constant 0 : index
      %132 = vector.load %arg11[%c0_35, %c0_36] : memref<16x128xf32, #tpu.memory_space<vmem>>, vector<16x128xf32>
      tpu.vector_store %arg11[%c0_35, %c0_36], %129 {strides = array<i32>} : memref<16x128xf32, #tpu.memory_space<vmem>>, vector<16x128xf32>,
      %c0_37 = arith.constant 0 : index
      %c0_38 = arith.constant 0 : index
      %133 = vector.load %arg12[%c0_37, %c0_38] : memref<16x128xi32, #tpu.memory_space<vmem>>, vector<16x128xi32>
      tpu.vector_store %arg12[%c0_37, %c0_38], %131 {strides = array<i32>} : memref<16x128xi32, #tpu.memory_space<vmem>>, vector<16x128xi32>,
    } else {
    }
    %c2_i32_3 = arith.constant 2 : i32
    %6 = arith.cmpi sge, %arg1, %c2_i32_3 : i32
    %7 = arith.extui %6 : i1 to i32
    %c0_i32_4 = arith.constant 0 : i32
    %8 = arith.cmpi ne, %7, %c0_i32_4 : i32
    scf.if %8 {
      %c2_i32_6 = arith.constant 2 : i32
      %12 = arith.subi %arg1, %c2_i32_6 : i32
      %13 = tpu.iota {dimensions = array<i32: 1>} : vector<16x256xi32>
      %c256_i32 = arith.constant 256 : i32
      %14 = arith.muli %12, %c256_i32 : i32
      %15 = vector.broadcast %14 : i32 to vector<16x256xi32>
      %16 = arith.addi %13, %15 : vector<16x256xi32>
      %c0 = arith.constant 0 : index
      %c0_7 = arith.constant 0 : index
      %17 = vector.load %arg11[%c0, %c0_7] : memref<16x128xf32, #tpu.memory_space<vmem>>, vector<16x128xf32>
      %c0_8 = arith.constant 0 : index
      %c0_9 = arith.constant 0 : index
      %18 = vector.load %arg12[%c0_8, %c0_9] : memref<16x128xi32, #tpu.memory_space<vmem>>, vector<16x128xi32>
      %cst_10 = arith.constant 0.000000e+00 : f32
      %19 = vector.broadcast %cst_10 : f32 to vector<16x256xf32>
      %20 = vector.extract_strided_slice %17 {offsets = [0, 0], sizes = [16, 1], strides = [1, 1]} : vector<16x128xf32> to vector<16x1xf32>
      %21 = vector.extract_strided_slice %18 {offsets = [0, 0], sizes = [16, 1], strides = [1, 1]} : vector<16x128xi32> to vector<16x1xi32>
      %22 = vector.broadcast %21 : vector<16x1xi32> to vector<16x256xi32>
      %23 = arith.cmpi eq, %16, %22 : vector<16x256xi32>
      %cst_11 = arith.constant 0.000000e+00 : f32
      %24 = vector.shape_cast %20 : vector<16x1xf32> to vector<16x1xf32>
      %25 = vector.broadcast %24 : vector<16x1xf32> to vector<16x256xf32>
      %26 = vector.broadcast %cst_11 : f32 to vector<16x256xf32>
      %27 = arith.select %23, %25, %26 : vector<16x256xi1>, vector<16x256xf32>
      %28 = arith.addf %19, %27 : vector<16x256xf32>
      %29 = vector.extract_strided_slice %17 {offsets = [0, 1], sizes = [16, 1], strides = [1, 1]} : vector<16x128xf32> to vector<16x1xf32>
      %30 = vector.extract_strided_slice %18 {offsets = [0, 1], sizes = [16, 1], strides = [1, 1]} : vector<16x128xi32> to vector<16x1xi32>
      %31 = vector.broadcast %30 : vector<16x1xi32> to vector<16x256xi32>
      %32 = arith.cmpi eq, %16, %31 : vector<16x256xi32>
      %cst_12 = arith.constant 0.000000e+00 : f32
      %33 = vector.shape_cast %29 : vector<16x1xf32> to vector<16x1xf32>
      %34 = vector.broadcast %33 : vector<16x1xf32> to vector<16x256xf32>
      %35 = vector.broadcast %cst_12 : f32 to vector<16x256xf32>
      %36 = arith.select %32, %34, %35 : vector<16x256xi1>, vector<16x256xf32>
      %37 = arith.addf %28, %36 : vector<16x256xf32>
      %38 = vector.extract_strided_slice %17 {offsets = [0, 2], sizes = [16, 1], strides = [1, 1]} : vector<16x128xf32> to vector<16x1xf32>
      %39 = vector.extract_strided_slice %18 {offsets = [0, 2], sizes = [16, 1], strides = [1, 1]} : vector<16x128xi32> to vector<16x1xi32>
      %40 = vector.broadcast %39 : vector<16x1xi32> to vector<16x256xi32>
      %41 = arith.cmpi eq, %16, %40 : vector<16x256xi32>
      %cst_13 = arith.constant 0.000000e+00 : f32
      %42 = vector.shape_cast %38 : vector<16x1xf32> to vector<16x1xf32>
      %43 = vector.broadcast %42 : vector<16x1xf32> to vector<16x256xf32>
      %44 = vector.broadcast %cst_13 : f32 to vector<16x256xf32>
      %45 = arith.select %41, %43, %44 : vector<16x256xi1>, vector<16x256xf32>
      %46 = arith.addf %37, %45 : vector<16x256xf32>
      %47 = vector.extract_strided_slice %17 {offsets = [0, 3], sizes = [16, 1], strides = [1, 1]} : vector<16x128xf32> to vector<16x1xf32>
      %48 = vector.extract_strided_slice %18 {offsets = [0, 3], sizes = [16, 1], strides = [1, 1]} : vector<16x128xi32> to vector<16x1xi32>
      %49 = vector.broadcast %48 : vector<16x1xi32> to vector<16x256xi32>
      %50 = arith.cmpi eq, %16, %49 : vector<16x256xi32>
      %cst_14 = arith.constant 0.000000e+00 : f32
      %51 = vector.shape_cast %47 : vector<16x1xf32> to vector<16x1xf32>
      %52 = vector.broadcast %51 : vector<16x1xf32> to vector<16x256xf32>
      %53 = vector.broadcast %cst_14 : f32 to vector<16x256xf32>
      %54 = arith.select %50, %52, %53 : vector<16x256xi1>, vector<16x256xf32>
      %55 = arith.addf %46, %54 : vector<16x256xf32>
      %c0_15 = arith.constant 0 : index
      %c0_16 = arith.constant 0 : index
      %56 = vector.load %arg13[%c0_15, %c0_16] : memref<16x128xf32, #tpu.memory_space<vmem>>, vector<16x128xf32>
      %57 = arith.truncf %55 : vector<16x256xf32> to vector<16x256xbf16>
      %c0_17 = arith.constant 0 : index
      %c0_18 = arith.constant 0 : index
      %58 = vector.load %arg5[%c0_17, %c0_18] : memref<256x128xbf16, #tpu.memory_space<vmem>>, vector<256x128xbf16>
      %cst_19 = arith.constant dense<0.000000e+00> : vector<16x128xf32>
      %59 = tpu.matmul %57, %58, %cst_19 {dimension_numbers = #tpu.dot_dimension_numbers<[1], [0], [0], [1], [0, 0, 1, 1], [], []>} : vector<16x256xbf16>, vector<256x128xbf16>, vector<16x128xf32> -> vector<16x128xf32>
      %60 = arith.addf %56, %59 : vector<16x128xf32>
      %c0_20 = arith.constant 0 : index
      %c0_21 = arith.constant 0 : index
      %61 = vector.load %arg13[%c0_20, %c0_21] : memref<16x128xf32, #tpu.memory_space<vmem>>, vector<16x128xf32>
      tpu.vector_store %arg13[%c0_20, %c0_21], %60 {strides = array<i32>} : memref<16x128xf32, #tpu.memory_space<vmem>>, vector<16x128xf32>,
    } else {
    }
    %c3_i32 = arith.constant 3 : i32
    %9 = arith.cmpi eq, %arg1, %c3_i32 : i32
    %10 = arith.extui %9 : i1 to i32
    %c0_i32_5 = arith.constant 0 : i32
    %11 = arith.cmpi ne, %10, %c0_i32_5 : i32
    scf.if %11 {
      %c0 = arith.constant 0 : index
      %c0_6 = arith.constant 0 : index
      %12 = vector.load %arg2[%c0, %c0_6] : memref<16x128xf32, #tpu.memory_space<vmem>>, vector<16x128xf32>
      %c0_7 = arith.constant 0 : index
      %c0_8 = arith.constant 0 : index
      %13 = vector.load %arg6[%c0_7, %c0_8] : memref<1x128xbf16, #tpu.memory_space<vmem>>, vector<1x128xbf16>
      %14 = arith.extf %13 : vector<1x128xbf16> to vector<1x128xf32>
      %c0_9 = arith.constant 0 : index
      %c0_10 = arith.constant 0 : index
      %15 = vector.load %arg13[%c0_9, %c0_10] : memref<16x128xf32, #tpu.memory_space<vmem>>, vector<16x128xf32>
      %16 = vector.broadcast %14 : vector<1x128xf32> to vector<16x128xf32>
      %17 = arith.addf %15, %16 : vector<16x128xf32>
      %c0_11 = arith.constant 0 : index
      %c0_12 = arith.constant 0 : index
      %18 = vector.load %arg7[%c0_11, %c0_12] : memref<16x128xf32, #tpu.memory_space<vmem>>, vector<16x128xf32>
      tpu.vector_store %arg7[%c0_11, %c0_12], %17 {strides = array<i32>} : memref<16x128xf32, #tpu.memory_space<vmem>>, vector<16x128xf32>,
      %c0_13 = arith.constant 0 : index
      %c0_14 = arith.constant 0 : index
      %19 = vector.load %arg11[%c0_13, %c0_14] : memref<16x128xf32, #tpu.memory_space<vmem>>, vector<16x128xf32>
      %c0_15 = arith.constant 0 : index
      %c0_16 = arith.constant 0 : index
      %20 = vector.load %arg8[%c0_15, %c0_16] : memref<16x128xf32, #tpu.memory_space<vmem>>, vector<16x128xf32>
      tpu.vector_store %arg8[%c0_15, %c0_16], %19 {strides = array<i32>} : memref<16x128xf32, #tpu.memory_space<vmem>>, vector<16x128xf32>,
      %c0_17 = arith.constant 0 : index
      %c0_18 = arith.constant 0 : index
      %21 = vector.load %arg12[%c0_17, %c0_18] : memref<16x128xi32, #tpu.memory_space<vmem>>, vector<16x128xi32>
      %c0_19 = arith.constant 0 : index
      %c0_20 = arith.constant 0 : index
      %22 = vector.load %arg9[%c0_19, %c0_20] : memref<16x128xi32, #tpu.memory_space<vmem>>, vector<16x128xi32>
      tpu.vector_store %arg9[%c0_19, %c0_20], %21 {strides = array<i32>} : memref<16x128xi32, #tpu.memory_space<vmem>>, vector<16x128xi32>,
      %23 = tpu.iota {dimensions = array<i32: 0>} : vector<16x1xi32>
      %c16_i32 = arith.constant 16 : i32
      %24 = arith.muli %arg0, %c16_i32 : i32
      %25 = vector.broadcast %24 : i32 to vector<16x1xi32>
      %26 = arith.addi %23, %25 : vector<16x1xi32>
      %c16_i32_21 = arith.constant 16 : i32
      %27 = vector.broadcast %c16_i32_21 : i32 to vector<16x1xi32>
      %28 = arith.cmpi slt, %26, %27 : vector<16x1xi32>
      %29 = arith.extui %28 : vector<16x1xi1> to vector<16x1xi32>
      %30 = arith.sitofp %29 : vector<16x1xi32> to vector<16x1xf32>
      %31 = arith.subf %17, %12 : vector<16x128xf32>
      %32 = vector.broadcast %30 : vector<16x1xf32> to vector<16x128xf32>
      %33 = arith.mulf %31, %32 : vector<16x128xf32>
      %34 = vector.broadcast %30 : vector<16x1xf32> to vector<16x128xf32>
      %35 = arith.mulf %12, %34 : vector<16x128xf32>
      %36 = arith.mulf %33, %33 : vector<16x128xf32>
      %cst_22 = arith.constant dense<0.000000e+00> : vector<128xf32>
      %37 = vector.multi_reduction <add>, %36, %cst_22 [0] : vector<16x128xf32> to vector<128xf32>
      %38 = vector.shape_cast %37 : vector<128xf32> to vector<1x128xf32>
      %cst_23 = arith.constant dense<0.000000e+00> : vector<128xf32>
      %39 = vector.multi_reduction <add>, %35, %cst_23 [0] : vector<16x128xf32> to vector<128xf32>
      %40 = vector.shape_cast %39 : vector<128xf32> to vector<1x128xf32>
      %41 = arith.mulf %35, %35 : vector<16x128xf32>
      %cst_24 = arith.constant dense<0.000000e+00> : vector<128xf32>
      %42 = vector.multi_reduction <add>, %41, %cst_24 [0] : vector<16x128xf32> to vector<128xf32>
      %43 = vector.shape_cast %42 : vector<128xf32> to vector<1x128xf32>
      %cst_25 = arith.constant 0.000000e+00 : f32
      %44 = vector.broadcast %cst_25 : f32 to vector<5x128xf32>
      %45 = tpu.concatenate %38, %40, %43, %44 in 0 : vector<1x128xf32>, vector<1x128xf32>, vector<1x128xf32>, vector<5x128xf32> -> vector<8x128xf32>
      %46 = vector.shape_cast %45 : vector<8x128xf32> to vector<1x8x128xf32>
      %c0_26 = arith.constant 0 : index
      %c0_27 = arith.constant 0 : index
      %c0_28 = arith.constant 0 : index
      %47 = vector.load %arg10[%c0_26, %c0_27, %c0_28] : memref<1x8x128xf32, #tpu.memory_space<vmem>>, vector<1x8x128xf32>
      tpu.vector_store %arg10[%c0_26, %c0_27, %c0_28], %46 {strides = array<i32>} : memref<1x8x128xf32, #tpu.memory_space<vmem>>, vector<1x8x128xf32>,
    } else {
    }
    return
  }
  func.func @transform_0(%arg0: i32, %arg1: i32) -> (i32, i32) {
    %c0_i32 = arith.constant 0 : i32
    %c0_i32_0 = arith.constant 0 : i32
    return %arg0, %c0_i32 : i32, i32
  }
  func.func @transform_1(%arg0: i32, %arg1: i32) -> (i32, i32) {
    %c1_i32 = arith.constant 1 : i32
    %0 = arith.minsi %arg1, %c1_i32 : i32
    %c0_i32 = arith.constant 0 : i32
    %c0_i32_0 = arith.constant 0 : i32
    return %0, %c0_i32 : i32, i32
  }
  func.func @transform_2(%arg0: i32, %arg1: i32) -> (i32, i32) {
    %c1_i32 = arith.constant 1 : i32
    %0 = arith.minsi %arg1, %c1_i32 : i32
    %c0_i32 = arith.constant 0 : i32
    %c0_i32_0 = arith.constant 0 : i32
    return %c0_i32, %0 : i32, i32
  }
  func.func @transform_3(%arg0: i32, %arg1: i32) -> (i32, i32) {
    %c2_i32 = arith.constant 2 : i32
    %0 = arith.subi %arg1, %c2_i32 : i32
    %c0_i32 = arith.constant 0 : i32
    %1 = arith.maxsi %0, %c0_i32 : i32
    %c0_i32_0 = arith.constant 0 : i32
    %c0_i32_1 = arith.constant 0 : i32
    return %1, %c0_i32_0 : i32, i32
  }
  func.func @transform_4(%arg0: i32, %arg1: i32) -> (i32, i32) {
    %c0_i32 = arith.constant 0 : i32
    %c0_i32_0 = arith.constant 0 : i32
    %c0_i32_1 = arith.constant 0 : i32
    return %c0_i32, %c0_i32_0 : i32, i32
  }
  func.func @transform_5(%arg0: i32, %arg1: i32) -> (i32, i32) {
    %c0_i32 = arith.constant 0 : i32
    %c0_i32_0 = arith.constant 0 : i32
    return %arg0, %c0_i32 : i32, i32
  }
  func.func @transform_6(%arg0: i32, %arg1: i32) -> (i32, i32) {
    %c0_i32 = arith.constant 0 : i32
    %c0_i32_0 = arith.constant 0 : i32
    return %arg0, %c0_i32 : i32, i32
  }
  func.func @transform_7(%arg0: i32, %arg1: i32) -> (i32, i32) {
    %c0_i32 = arith.constant 0 : i32
    %c0_i32_0 = arith.constant 0 : i32
    return %arg0, %c0_i32 : i32, i32
  }
  func.func @transform_8(%arg0: i32, %arg1: i32) -> (i32, i32, i32) {
    %c0_i32 = arith.constant 0 : i32
    %c0_i32_0 = arith.constant 0 : i32
    %c0_i32_1 = arith.constant 0 : i32
    return %arg0, %c0_i32, %c0_i32_0 : i32, i32, i32
  }
}

</mosaic_0001>

<bundles_post_ra>
// kernel: sae_forward.1
= control target key start
LH: loop header
LB: loop body
LE: loop exit
PB: predicated region body
PF: predicated region fallthrough
CT: control target
= control target key end

     0   :  { %s2722_s0 = inlined_call_operand.hbm [shape: f32[16,128], index: 0, kind: input, shape index: {}]   ;;  %s2723_s1 = inlined_call_operand.hbm [shape: bf16[512,128], index: 1, kind: input, shape index: {}]   ;;  %s2724_s2 = inlined_call_operand.vmem [shape: bf16[1,512], index: 2, kind: input, shape index: {}]   ;;  %s2725_s3 = inlined_call_operand.hbm [shape: bf16[512,128], index: 3, kind: input, shape index: {}]   ;;  %s2726_s4 = inlined_call_operand.vmem [shape: bf16[1,128], index: 4, kind: input, shape index: {}]   ;;  %s2727_s5 = inlined_call_operand.hbm [shape: f32[16,128], index: 5, kind: output, shape index: {0}]   ;;  %s2728_s6 = inlined_call_operand.vmem [shape: f32[16,128], index: 6, kind: output, shape index: {1}]   ;;  %s2729_s7 = inlined_call_operand.vmem [shape: s32[16,128], index: 7, kind: output, shape index: {2}]   ;;  %s2730_s8 = inlined_call_operand.vmem [shape: f32[1,8,128], index: 8, kind: output, shape index: {3}]  }
   0x1   :  { %2740 = sst [smem:[#allocation18_spill]] %s2723_s1 }
   0x2   :  { %2741 = sst [smem:[#allocation19_spill]] %s2727_s5 }
   0x3   :  { %2742 = sst [smem:[#allocation20_spill]] %s2728_s6 }
   0x4   :  { %2743 = sst [smem:[#allocation21_spill]] %s2729_s7 }
   0x5   :  { %2744 = sst [smem:[#allocation22_spill]] %s2730_s8 }
   0x6   :  { %14 = vsyncpa [#allocation6], 0 }
   0x7   :  { %15 = vsyncpa [#allocation9], 0 }
   0x8   :  { %17 = vsyncpa [#allocation9 + $0x1], 0 }
   0x9   :  { %18 = vsyncpa [#allocation7], 0  ;;  %s2253_s27 = smov 0   ;;  %s2255_s28 = smov 0  }
   0xa   :  { %s2257_s29 = smov 0   ;;  %s2259_s30 = smov 0  }
   0xb   :  { %s2261_s9 = smov 0   ;;  %s2263_s10 = smov 0  }
   0xc   :  { %s2265_s11 = smov 0   ;;  %s2267_s12 = smov 0  }
   0xd   :  { %s2269_s13 = smov 0  }
   0xe LB: > { %2745 = sst [smem:[#allocation16_spill]] %s2184_s12  ;;  %s33_s14 = sadd.s32 1, %s2184_s12  ;;  %s2188_s13 = sphi %s2269_s13, %s24_s13   ;;  %s2184_s12 = sphi %s2267_s12, %s2767_s12   ;;  %s2180_s11 = sphi %s2265_s11, %s2766_s11   ;;  %s2176_s10 = sphi %s2263_s10, %s2773_s10   ;;  %s2172_s9 = sphi %s2261_s9, %s2772_s9   ;;  %s2168_s30 = sphi %s2259_s30, %s2771_s30   ;;  %s2164_s29 = sphi %s2257_s29, %s2770_s29   ;;  %s2160_s28 = sphi %s2255_s28, %s2769_s28   ;;  %s2156_s27 = sphi %s2253_s27, %s2768_s27  }
   0xf   : > { %p66_p0 = scmp.lt.s32.totalorder %s2184_s12, 1  ;;  %p34_p1 = scmp.ge.s32.totalorder %s33_s14, 4 }
  0x10   : > { %s73_s15 = sadd.s32 1, %s2176_s10  ;;  %p80_p2 = scmp.ne.s32.totalorder %s2176_s10, %s2172_s9 }
  0x11   : > { %s67_s16 = scalar_select %p66_p0, %s2184_s12, 1 }
  0x12   : > { %s2775_s14 = smov (%p34_p1, %s33_s14), 0  ;;  %p2734_p3 = scmp.eq.s32.totalorder %s2188_s13, 0 }
  0x13   : > { %2746 = sst [smem:[#allocation17_spill]] %s2775_s14  ;;  %p68_p4 = scmp.lt.s32.totalorder %s2775_s14, 1 }
  0x14   : > { %p2310_p5 = por %p2734_p3, %p80_p2  ;;  %p2733_p6 = scmp.lt.s32.totalorder %s2188_s13, 4 }
  0x15   : > { %s69_s18 = scalar_select %p68_p4, %s2775_s14, 1 }
  0x16   : > { %s316_s19 = sand.u32 1, %s2188_s13   ;;  %s318_s20 = sand.u32 1, %s2176_s10  }
  0x17   : > { %s70_s21 = ssub.s32 %s67_s16, %s69_s18  ;;  %s1737_s22 = sshll.u32 %s318_s20, 7 }
  0x18   : > { %p71_p7 = scmp.eq.s32.totalorder %s70_s21, 0  ;;  %s1797_s23 = sshll.u32 %s67_s16, 11 }
  0x19   : > { %s2748_s1 = sld [smem:[#allocation18_spill]]  ;;  %s320_s8 = scalar_lea.vmem [#allocation8], %s1737_s22 }
  0x1a   : > { %s2319_s24 = scalar_select %p71_p7, %s2176_s10, %s73_s15  }
  0x1b   : > { %s329_s7 = sshll.u32 %s320_s8, 4  ;;  %p2328_p8 = pnand %p2733_p6, %p2310_p5  ;;  %s330_s7 = int_to_ptr.vmem [resolvable:$true] %s329_s7 }
  0x1c   : > { %s2332_s18 = scalar_lea.sflag [#allocation9], %s316_s19  ;;  %s2009_s15 = scalar_lea.vmem %s330_s7, 2048 }
  0x1d   : > { %p1998_p9 = pneg %p2328_p8  ;;  %p2010_p10 = scmp.ne.s32.totalorder %s330_s7, %s2009_s15 }
  0x1e   : > { %s2190_s16 = smov [#allocation8]  }
  0x1f   : > { %s328_s5 = scalar_lea.hbm %s2748_s1, %s1797_s23  ;;  %p2012_p11 = pnand %p2010_p10, %p1998_p9 }
  0x20   : > { %s2014_s20 = sshll.u32 %s2190_s16, 4  ;;  %s2015_s20 = int_to_ptr.vmem [resolvable:$false] %s2014_s20 }
  0x21   : > { %p2013_p12 = pneg %p2012_p11  ;;  %s2016_s8 = scalar_lea.vmem %s2015_s20, 4096 }
  0x22   : > { %p2017_p13 = scmp.lt.s32.totalorder %s330_s7, %s2015_s20  ;;  %p2018_p0 = scmp.lt.s32.totalorder %s2016_s8, %s2009_s15 }
  0x24   : > { %p2019_p1 = por %p2018_p0, %p2017_p13 }
  0x26   : > { %p2020_p2 = pnand %p2019_p1, %p2013_p12 }
  0x28   : > { %2023 = shalt.err (!%p2020_p2)
}
  0x29   : > { %s2735_s17 = smov 64   ;;  %s2736_s19 = smov 4  }
  0x2a   : > { %1858 = dma.hbm_to_vmem [thread:$0]  (!%p2328_p8), %s328_s5, 2048, %s330_s7, %s2332_s18, %s2735_s17, %s2735_s17, %s2736_s19  }
  0x2b   : > { %s2343_s21 = sadd.s32 4294967295, %s2188_s13   ;;  %p86_p4 = scmp.ne.s32.totalorder %s2172_s9, %s2168_s30 }
  0x2c   : > { %p2739_p5 = scmp.eq.s32.totalorder %s2343_s21, 0  ;;  %p148_p7 = scmp.ne.s32.totalorder %s2160_s28, %s2156_s27 }
  0x2d   : > { %p1734_p9 = scmp.ge.s32.totalorder %s2188_s13, 1  ;;  %p284_p11 = scmp.lt.s32.totalorder %s2188_s13, 5 }
  0x2e   : > { %p2353_p10 = por %p2739_p5, %p86_p4  ;;  %p2360_p12 = por %p148_p7, %p2739_p5 }
  0x2f   : > { %p2364_p8 = pnand %p1734_p9, %p284_p11  ;;  %s2193_s7 = smov [#allocation5]  }
  0x30   : > { %s299_s30 = sshll.u32 %s2193_s7, 4  ;;  %s1732_s23 = sadd.s32 4294967294, %s2184_s12  ;;  %s300_s30 = int_to_ptr.vmem [resolvable:$true] %s299_s30 }
  0x31   : > { %p1851_p13 = pneg %p2364_p8  ;;  %s1733_s25 = sadd.s32 4294967294, %s2775_s14 }
  0x32   : > { %p2378_p1 = scmp.gt.s32.totalorder %s1732_s23, 0  ;;  %s2035_s15 = scalar_lea.vmem %s300_s30, 256 }
  0x33   : > { %p2372_p0 = pnand %p1851_p13, %p2739_p5  ;;  %p2036_p4 = scmp.ne.s32.totalorder %s300_s30, %s2035_s15 }
  0x34   : > { %p2043_p11 = scmp.lt.s32.totalorder %s300_s30, %s300_s30  ;;  %p2044_p6 = scmp.lt.s32.totalorder %s2035_s15, %s2035_s15 }
  0x35   : > { %p2026_p2 = pneg %p2372_p0 }
  0x36   : > { %p2045_p3 = por %p2044_p6, %p2043_p11 }
  0x37   : > { %p2038_p7 = pnand %p2036_p4, %p2026_p2 }
  0x39   : > { %p2039_p9 = pneg %p2038_p7 }
  0x3b   : > { %p2046_p13 = pnand %p2045_p3, %p2039_p9 }
  0x3d   : > { %2049 = shalt.err (!%p2046_p13)
}
  0x3e   : > { %s2194_s16 = smov 128   ;;  %s2195_s20 = smov 8  }
  0x3f   : > { %1854 = dma.hbm_to_vmem [thread:$0]  (!%p2372_p0), %s2722_s0, 256, %s300_s30, [#allocation6], %s2194_s16, %s2194_s16, %s2195_s20  }
  0x40   : > { %s2777_s23 = smov (!%p2378_p1, %s1732_s23), 0  ;;  %p130_p3 = scmp.gt.s32.totalorder %s1733_s25, 0 }
  0x41   : > { %s135_s15 = sadd.s32 1, %s2164_s29  ;;  %p142_p6 = scmp.ne.s32.totalorder %s2164_s29, %s2160_s28 }
  0x42   : > { %s353_s17 = sand.u32 1, %s2164_s29   ;;  %s2779_s25 = smov (!%p130_p3, %s1733_s25), 0 }
  0x43   : > { %p2755_p2 = scmp.eq.s32.totalorder %s2188_s13, 0  ;;  %s1740_s19 = sshll.u32 %s353_s17, 7 }
  0x44   : > { %s132_s1 = ssub.s32 %s2777_s23, %s2779_s25  ;;  %s1798_s14 = sshll.u32 %s2777_s23, 11 }
  0x45   : > { %p144_p4 = por %p142_p6, %p2755_p2  ;;  %p133_p7 = scmp.eq.s32.totalorder %s132_s1, 0 }
  0x46   : > { %s364_s8 = scalar_lea.hbm %s2725_s3, %s1798_s14  ;;  %s355_s7 = scalar_lea.vmem [#allocation10], %s1740_s19 }
  0x47   : > { %s365_s30 = sshll.u32 %s355_s7, 4  ;;  %p2756_p0 = scmp.lt.s32.totalorder %s2188_s13, 4  ;;  %s366_s30 = int_to_ptr.vmem [resolvable:$true] %s365_s30 }
  0x48   : > { %s2401_s26 = scalar_select %p133_p7, %s2164_s29, %s135_s15  }
  0x49   : > { %p2405_p1 = pnand %p2756_p0, %p144_p4  ;;  %s2063_s17 = scalar_lea.vmem %s366_s30, 2048 }
  0x4a   : > { %p2064_p11 = scmp.ne.s32.totalorder %s366_s30, %s2063_s17  ;;  %s2196_s1 = smov [#allocation10]  }
  0x4b   : > { %p2052_p9 = pneg %p2405_p1  ;;  %s2068_s12 = sshll.u32 %s2196_s1, 4  ;;  %s2069_s12 = int_to_ptr.vmem [resolvable:$false] %s2068_s12 }
  0x4c   : > { %s2070_s14 = scalar_lea.vmem %s2069_s12, 4096  ;;  %p2071_p6 = scmp.lt.s32.totalorder %s366_s30, %s2069_s12 }
  0x4d   : > { %p2066_p13 = pnand %p2064_p11, %p2052_p9  ;;  %p2072_p2 = scmp.lt.s32.totalorder %s2070_s14, %s2063_s17 }
  0x4f   : > { %p2067_p3 = pneg %p2066_p13  ;;  %p2073_p7 = por %p2072_p2, %p2071_p6 }
  0x51   : > { %p2074_p5 = pnand %p2073_p7, %p2067_p3 }
  0x53   : > { %2077 = shalt.err (!%p2074_p5)
}
  0x54   : > { %s2758_s19 = smov 4   ;;  %s2759_s23 = smov 64  }
  0x55   : > { %1861 = dma.hbm_to_vmem [thread:$0]  (!%p2405_p1), %s364_s8, 2048, %s366_s30, %s2332_s18, %s2759_s23, %s2759_s23, %s2758_s19  }
  0x56   : > { %377 = sbr.rel (%p2364_p8) target bundleno = 4280 (0x10b8), region = 40  ;;  %p2760_p4 = scmp.eq.s32.totalorder (!%p2364_p8), %s2343_s21, 0 }
  0x5b   : > { %2139 = dma.done.wait (%p2760_p4), [#allocation6], 256   ;;  %p2761_p0 = pmov %p2760_p4 }
  0x5c   : > { %s383_s25 = sand.u32 1, %s2343_s21   ;;  %s385_s20 = sand.u32 1, %s2172_s9  }
  0x5d   : > { %2141 = vsyncadd (%p2761_p0), [#allocation6], 4294967040  ;;  %s1746_s15 = sshll.u32 %s385_s20, 7  ;;  %s384_s27 = scalar_lea.sflag [#allocation9], %s383_s25 }
  0x5e   : > { %s2425_s7 = scalar_lea.vmem [#allocation8], %s1746_s15 }
  0x5f   : > { %2143 = dma.done.wait (%p2353_p10), %s384_s27, 2048  }
  0x60   : > { %2145 = vsyncadd (%p2353_p10), %s384_s27, 4294965248  ;;  %s394_s18 = sand.u32 1, %s2160_s28  }
  0x61   : > { %s1747_s6 = sshll.u32 %s394_s18, 7 }
  0x62   : > { %s2432_s8 = scalar_lea.vmem [#allocation10], %s1747_s6 }
  0x63   : > { %2147 = dma.done.wait (%p2360_p12), %s384_s27, 2048  }
  0x64   : > { %2149 = vsyncadd (%p2360_p12), %s384_s27, 4294965248  ;;  %p453_p5 = scmp.lt.s32.totalorder %s2180_s11, 1  ;;  %p1749_p10 = scmp.ne.s32.totalorder %s2180_s11, 0 }
  0x66   : > { %s454_s30 = scalar_select %p453_p5, %s2180_s11, 1 }
  0x68   : > { %s1748_s16 = sshll.u32 %s454_s30, 1  ;;  %487 = sbr.rel (%p1749_p10) target bundleno = 113 (0x71), region = 56 }
  0x69   : > { %p456_p8 = scmp.lt.s32.totalorder %s1748_s16, 3 }
  0x6b   : > { %s2781_s16 = smov (!%p456_p8, %s1748_s16), 3 }
  0x6c   : > { %s458_s1 = scalar_lea.vmem %s2724_s2, %s2781_s16 }
  0x6d   : > { %v2197_v0 = vmov -inf   ;;  %v2198_v1 = vmov 4294967295   ;;  %v2199_v2 = vmov 0.0  }
  0x6e   : > { %488 = vst [vmem:[#allocation2] sm:$0xff] %v2197_v0  ;;  %489 = vst [vmem:[#allocation2 + $0x8] sm:$0xff] %v2197_v0 }
  0x6f   : > { %490 = vst [vmem:[#allocation3 + $0x8] sm:$0xff] %v2198_v1  ;;  %491 = vst [vmem:[#allocation3] sm:$0xff] %v2198_v1 }
  0x70   : > { %492 = vst [vmem:[#allocation4 + $0x8] sm:$0xff] %v2199_v2  ;;  %493 = vst [vmem:[#allocation4] sm:$0xff] %v2199_v2 }
  0x71 PF: > { %p1750_p12 = scmp.ge.s32.totalorder %s2180_s11, 2 }
  0x72   : > { %s1767_s23 = sshll.u32 (!%p1750_p12), %s2180_s11, 8  ;;  %s2200_s25 = smov (!%p1750_p12), 4  }
  0x73   : > { %497 = sbr.rel (%p1750_p12) target bundleno = 3840 (0xf00), region = 60 }
  0x78   : > { %v1955_v3 = vld [vmem:[%s2425_s7 + $0x78] sm:$0xff]   ;;  %v1957_v5 = vld [vmem:[%s2425_s7 + $0x70] sm:$0xff]   ;;  %v502_v7 = vlaneseq  ;;  %v1959_v8 = vld [vmem:[%s2425_s7 + $0x68] sm:$0xff]   ;;  %v709_v53 = vstv %s1767_s23 }
  0x79   : > { %v1956_v4 = vld [vmem:[%s2425_s7 + $0x38] sm:$0xff]   ;;  %1799 = vmatprep.subr.bf16.mxu0 %v1955_v3  ;;  %v1958_v6 = vld [vmem:[%s2425_s7 + $0x30] sm:$0xff]   ;;  %v1960_v10 = vld [vmem:[%s2425_s7 + $0x28] sm:$0xff]  }
  0x7a   : > { %1800 = vmatpush3.bf16.xpose.msra.mxu0 %v1956_v4  ;;  %v503_v9 = vshrl.u32 %v502_v7, 7  ;;  %v1961_v12 = vld [vmem:[%s2425_s7 + $0x60] sm:$0xff]   ;;  %v498_v15 = vld [vmem:[#allocation5] sm:$0xff]  ;;  %v499_v16 = vld [vmem:[#allocation5 + $0x8] sm:$0xff]  ;;  %v706_v51 = vand.u32 127, %v502_v7 }
  0x7b   : > { %1801 = vmatprep.subr.bf16.mxu0 %v1957_v5  ;;  %v500_v13 = vld [vmem:[%s2726_s4] sm:$0x1]  ;;  %v1963_v22 = vld [vmem:[%s2425_s7 + $0x58] sm:$0xff]   ;;  %v1965_v24 = vld [vmem:[%s2425_s7 + $0x50] sm:$0xff]  }
  0x7c   : > { %v504_v11 = vsub.s32 0, %v503_v9  ;;  %v501_v14 = vunpack.c.l.bf16 %v500_v13  ;;  %v1962_v20 = vld [vmem:[%s2425_s7 + $0x20] sm:$0xff]   ;;  %v1964_v23 = vld [vmem:[%s2425_s7 + $0x18] sm:$0xff]   ;;  %v1966_v25 = vld [vmem:[%s2425_s7 + $0x10] sm:$0xff]   ;;  %v550_v32 = vsub.s32 2, %v503_v9  ;;  %v707_v52 = vadd.s32 128, %v706_v51 }
  0x7d   : > { %v1967_v26 = vld [vmem:[%s2425_s7 + $0x48] sm:$0xff]   ;;  %v1969_v28 = vld [vmem:[%s2425_s7 + $0x40] sm:$0xff]   ;;  %v2473_v54 = vadd.s32 %v709_v53, %v706_v51 }
  0x7e   : > { %v505_v17 = vrot.slane %v501_v14, %v504_v11  ;;  %v1968_v27 = vld [vmem:[%s2425_s7 + $0x8] sm:$0xff]   ;;  %v1970_v29 = vld [vmem:[%s2425_s7] sm:$0xff]   ;;  %v2475_v55 = vadd.s32 %v709_v53, %v707_v52 }
  0x7f   : > { %v541_v30 = vld [vmem:[%s458_s1] sm:$0x3] }
  0x80   : > { %v506_v18 = vsub.f32 %v498_v15, %v505_v17  ;;  %v507_v19 = vsub.f32 %v499_v16, %v505_v17  ;;  %v542_v31 = vunpack.c.l.bf16 %v541_v30 }
  0x82   : > { %1802 = vmatpush3.bf16.xpose.msra.mxu0 %v1958_v6  ;;  %v508_v21 = vpack.c.bf16 %v507_v19, %v506_v18  ;;  %v547_v33 = vrot.slane %v542_v31, %v504_v11  ;;  %v551_v34 = vrot.slane %v542_v31, %v550_v32 }
  0x83   : > { %1803 = vmatprep.subr.bf16.mxu0 %v1959_v8 }
  0x84   : > { %1815 = vmatprep.mubr.bf16.mxu0 %v508_v21  ;;  %v557_v35 = vrot.slane %v547_v33, %v504_v11  ;;  %v561_v36 = vrot.slane %v551_v34, %v504_v11 }
  0x8a   : > { %1804 = vmatpush3.bf16.xpose.msra.mxu0 %v1960_v10 }
  0x8b   : > { %1805 = vmatprep.subr.bf16.mxu0 %v1961_v12 }
  0x92   : > { %1806 = vmatpush3.bf16.xpose.msra.mxu0 %v1962_v20 }
  0x93   : > { %1807 = vmatprep.subr.bf16.mxu0 %v1963_v22 }
  0x9a   : > { %1808 = vmatpush3.bf16.xpose.msra.mxu0 %v1964_v23 }
  0x9b   : > { %1809 = vmatprep.subr.bf16.mxu0 %v1965_v24 }
  0xa2   : > { %1810 = vmatpush3.bf16.xpose.msra.mxu0 %v1966_v25 }
  0xa3   : > { %1811 = vmatprep.subr.bf16.mxu0 %v1967_v26 }
  0xaa   : > { %1812 = vmatpush3.bf16.xpose.msra.mxu0 %v1968_v27 }
  0xab   : > { %1813 = vmatprep.subr.bf16.mxu0 %v1969_v28 }
  0xb2   : > { %1814 = vmatpush3.bf16.xpose.msra.mxu0 %v1970_v29 }
  0xb9   : > { %1816 = vmatmul.mubr.bf16.vlgmr.msra.gmra.mxu0 %v508_v21 }
 0x179   : > { %v692_v37 = vpop.f32.mrf.mxu0 }
 0x17a   : > { %v693_v38 = vadd.f32 %v692_v37, %v557_v35 }
 0x17b   : > { %v694_v39 = vpop.f32.mrf.mxu0 }
 0x17c   : > { %v695_v40 = vadd.f32 %v694_v39, %v561_v36  ;;  %v701_v42 = vmax.f32 %v693_v38, 0.0 }
 0x17d   : > { %v696_v41 = vpop.f32.mrf.mxu0 }
 0x17e   : > { %v702_v43 = vmax.f32 %v695_v40, 0.0  ;;  %v697_v44 = vadd.f32 %v696_v41, %v557_v35 }
 0x17f   : > { %v698_v45 = vpop.f32.mrf.mxu0 }
 0x180   : > { %v699_v46 = vadd.f32 %v698_v45, %v561_v36  ;;  %v712_v47 = vmax.f32 %v701_v42, %v702_v43  ;;  %v703_v48 = vmax.f32 %v697_v44, 0.0 }
 0x182   : > { %v704_v49 = vmax.f32 %v699_v46, 0.0  ;;  %713 = vmax.xlane.f32.xlu0 %v712_v47 }
 0x184   : > { %v715_v50 = vmax.f32 %v703_v48, %v704_v49 }
 0x186   : > { %716 = vmax.xlane.f32.xlu0 %v715_v50 }
 0x20b   : > { %v2477_v56 = vpop.xlane.xlu0 %713 }
 0x20c   : > { %vm718_vm0 = vcmp.eq.f32.partialorder %v701_v42, %v2477_v56  ;;  %vm719_vm1 = vcmp.eq.f32.partialorder %v702_v43, %v2477_v56 }
 0x20d   : > { %v722_v57 = vsel %vm718_vm0, %v2473_v54, 1073741824  ;;  %v723_v58 = vsel %vm719_vm1, %v2475_v55, 1073741824 }
 0x20e   : > { %vm726_vm2 = vcmp.lt.s32.totalorder %v722_v57, %v723_v58 }
 0x20f   : > { %v2483_v59 = vpop.xlane.xlu0 %716  ;;  %v727_v60 = vsel %vm726_vm2, %v722_v57, %v723_v58 }
 0x210   : > { %vm720_vm3 = vcmp.eq.f32.partialorder %v703_v48, %v2483_v59  ;;  %vm721_vm4 = vcmp.eq.f32.partialorder %v704_v49, %v2483_v59  ;;  %v729_v61 = vshra.s32 %v727_v60, 16  ;;  %v728_v4 = vand.u32 65535, %v727_v60 }
 0x211   : > { %v724_v62 = vsel %vm720_vm3, %v2473_v54, 1073741824  ;;  %v725_v63 = vsel %vm721_vm4, %v2475_v55, 1073741824 }
 0x212   : > { %v731_v0 = vcvt.s32.f32 %v729_v61  ;;  %vm742_vm5 = vcmp.lt.s32.totalorder %v724_v62, %v725_v63  ;;  %v730_v6 = vcvt.s32.f32 %v728_v4 }
 0x213   : > { %v743_v1 = vsel %vm742_vm5, %v724_v62, %v725_v63 }
 0x214   : > { %732 = vmin.xlane.f32.xlu1 %v731_v0  ;;  %v745_v2 = vshra.s32 %v743_v1, 16  ;;  %v744_v7 = vand.u32 65535, %v743_v1 }
 0x216   : > { %v747_v3 = vcvt.s32.f32 %v745_v2  ;;  %v746_v10 = vcvt.s32.f32 %v744_v7 }
 0x218   : > { %748 = vmin.xlane.f32.xlu1 %v747_v3 }
 0x29d   : > { %v733_v5 = vpop.xlane.xlu1 %732 }
 0x29e   : > { %vm734_vm6 = vcmp.eq.f32.partialorder %v731_v0, %v733_v5  ;;  %v739_v12 = vcvt.f32.s32 %v733_v5 }
 0x29f   : > { %v735_v8 = vsel %vm734_vm6, %v730_v6, inf }
 0x2a0   : > { %736 = vmin.xlane.f32.xlu0 %v735_v8  ;;  %v740_v14 = vshll.u32 %v739_v12, 16 }
 0x2a1   : > { %v749_v9 = vpop.xlane.xlu1 %748 }
 0x2a2   : > { %vm750_vm7 = vcmp.eq.f32.partialorder %v747_v3, %v749_v9  ;;  %v755_v15 = vcvt.f32.s32 %v749_v9 }
 0x2a3   : > { %v751_v11 = vsel %vm750_vm7, %v746_v10, inf }
 0x2a4   : > { %752 = vmin.xlane.f32.xlu1 %v751_v11  ;;  %v756_v19 = vshll.u32 %v755_v15, 16 }
 0x329   : > { %v737_v13 = vpop.xlane.xlu0 %736 }
 0x32a   : > { %v738_v16 = vcvt.f32.s32 %v737_v13 }
 0x32c   : > { %v2489_v17 = vadd.s32 %v740_v14, %v738_v16 }
 0x32d   : > { %v753_v18 = vpop.xlane.xlu1 %752 }
 0x32e   : > { %v754_v20 = vcvt.f32.s32 %v753_v18  ;;  %vm758_vm8 = vcmp.eq.s32.totalorder %v2473_v54, %v2489_v17  ;;  %vm759_vm9 = vcmp.eq.s32.totalorder %v2475_v55, %v2489_v17 }
 0x32f   : > { %v762_v21 = vsel %vm758_vm8, -inf, %v701_v42  ;;  %v763_v22 = vsel %vm759_vm9, -inf, %v702_v43 }
 0x330   : > { %v2495_v23 = vadd.s32 %v756_v19, %v754_v20  ;;  %v766_v24 = vmax.f32 %v762_v21, %v763_v22 }
 0x332   : > { %767 = vmax.xlane.f32.xlu0 %v766_v24  ;;  %vm760_vm10 = vcmp.eq.s32.totalorder %v2473_v54, %v2495_v23  ;;  %vm761_vm11 = vcmp.eq.s32.totalorder %v2475_v55, %v2495_v23 }
 0x333   : > { %v764_v25 = vsel %vm760_vm10, -inf, %v703_v48  ;;  %v765_v26 = vsel %vm761_vm11, -inf, %v704_v49 }
 0x334   : > { %v769_v27 = vmax.f32 %v764_v25, %v765_v26 }
 0x336   : > { %770 = vmax.xlane.f32.xlu1 %v769_v27 }
 0x3bb   : > { %v2501_v28 = vpop.xlane.xlu0 %767 }
 0x3bc   : > { %vm772_vm12 = vcmp.eq.f32.partialorder %v762_v21, %v2501_v28  ;;  %vm773_vm13 = vcmp.eq.f32.partialorder %v763_v22, %v2501_v28 }
 0x3bd   : > { %v776_v29 = vsel %vm772_vm12, %v2473_v54, 1073741824  ;;  %v777_v30 = vsel %vm773_vm13, %v2475_v55, 1073741824 }
 0x3be   : > { %vm780_vm14 = vcmp.lt.s32.totalorder %v776_v29, %v777_v30 }
 0x3bf   : > { %v2507_v31 = vpop.xlane.xlu1 %770  ;;  %v781_v32 = vsel %vm780_vm14, %v776_v29, %v777_v30 }
 0x3c0   : > { %vm774_vm15 = vcmp.eq.f32.partialorder %v764_v25, %v2507_v31  ;;  %vm775_vm0 = vcmp.eq.f32.partialorder %v765_v26, %v2507_v31  ;;  %v783_v33 = vshra.s32 %v781_v32, 16  ;;  %v782_v40 = vand.u32 65535, %v781_v32 }
 0x3c1   : > { %v778_v34 = vsel %vm774_vm15, %v2473_v54, 1073741824  ;;  %v779_v35 = vsel %vm775_vm0, %v2475_v55, 1073741824  ;;  %vm920_vm0 = vcmask 7168  }
 0x3c2   : > { %v785_v36 = vcvt.s32.f32 %v783_v33  ;;  %vm796_vm1 = vcmp.lt.s32.totalorder %v778_v34, %v779_v35  ;;  %v784_v42 = vcvt.s32.f32 %v782_v40 }
 0x3c3   : > { %v797_v37 = vsel %vm796_vm1, %v778_v34, %v779_v35  ;;  %vm923_vm1 = vcmask 15360  }
 0x3c4   : > { %786 = vmin.xlane.f32.xlu0 %v785_v36  ;;  %v799_v38 = vshra.s32 %v797_v37, 16  ;;  %v798_v43 = vand.u32 65535, %v797_v37 }
 0x3c6   : > { %v801_v39 = vcvt.s32.f32 %v799_v38  ;;  %v800_v46 = vcvt.s32.f32 %v798_v43 }
 0x3c8   : > { %802 = vmin.xlane.f32.xlu1 %v801_v39 }
 0x44d   : > { %v787_v41 = vpop.xlane.xlu0 %786 }
 0x44e   : > { %vm788_vm2 = vcmp.eq.f32.partialorder %v785_v36, %v787_v41  ;;  %v793_v48 = vcvt.f32.s32 %v787_v41 }
 0x44f   : > { %v789_v44 = vsel %vm788_vm2, %v784_v42, inf }
 0x450   : > { %790 = vmin.xlane.f32.xlu0 %v789_v44  ;;  %v794_v50 = vshll.u32 %v793_v48, 16 }
 0x451   : > { %v803_v45 = vpop.xlane.xlu1 %802 }
 0x452   : > { %vm804_vm3 = vcmp.eq.f32.partialorder %v801_v39, %v803_v45  ;;  %v809_v51 = vcvt.f32.s32 %v803_v45 }
 0x453   : > { %v805_v47 = vsel %vm804_vm3, %v800_v46, inf }
 0x454   : > { %806 = vmin.xlane.f32.xlu1 %v805_v47  ;;  %v810_v58 = vshll.u32 %v809_v51, 16 }
 0x4d9   : > { %v791_v49 = vpop.xlane.xlu0 %790 }
 0x4da   : > { %v792_v52 = vcvt.f32.s32 %v791_v49 }
 0x4dc   : > { %v795_v53 = vadd.s32 %v794_v50, %v792_v52 }
 0x4dd   : > { %v807_v57 = vpop.xlane.xlu1 %806 }
 0x4de   : > { %v808_v60 = vcvt.f32.s32 %v807_v57  ;;  %vm812_vm4 = vcmp.eq.s32.totalorder %v2473_v54, %v795_v53  ;;  %vm813_vm5 = vcmp.eq.s32.totalorder %v2475_v55, %v795_v53  ;;  %v929_v36 = vsel %vm920_vm0, %v2489_v17, %v795_v53 }
 0x4df   : > { %v816_v61 = vsel %vm812_vm4, -inf, %v762_v21  ;;  %v817_v62 = vsel %vm813_vm5, -inf, %v763_v22 }
 0x4e0   : > { %v811_v63 = vadd.s32 %v810_v58, %v808_v60  ;;  %v820_v0 = vmax.f32 %v816_v61, %v817_v62 }
 0x4e2   : > { %821 = vmax.xlane.f32.xlu0 %v820_v0  ;;  %vm814_vm6 = vcmp.eq.s32.totalorder %v2473_v54, %v811_v63  ;;  %vm815_vm7 = vcmp.eq.s32.totalorder %v2475_v55, %v811_v63  ;;  %v930_v43 = vsel %vm920_vm0, %v2495_v23, %v811_v63 }
 0x4e3   : > { %v818_v1 = vsel %vm814_vm6, -inf, %v764_v25  ;;  %v819_v2 = vsel %vm815_vm7, -inf, %v765_v26 }
 0x4e4   : > { %v823_v3 = vmax.f32 %v818_v1, %v819_v2 }
 0x4e6   : > { %824 = vmax.xlane.f32.xlu1 %v823_v3 }
 0x56b   : > { %v2517_v4 = vpop.xlane.xlu0 %821 }
 0x56c   : > { %vm826_vm8 = vcmp.eq.f32.partialorder %v816_v61, %v2517_v4  ;;  %vm827_vm9 = vcmp.eq.f32.partialorder %v817_v62, %v2517_v4 }
 0x56d   : > { %v830_v5 = vsel %vm826_vm8, %v2473_v54, 1073741824  ;;  %v831_v6 = vsel %vm827_vm9, %v2475_v55, 1073741824 }
 0x56e   : > { %vm834_vm10 = vcmp.lt.s32.totalorder %v830_v5, %v831_v6 }
 0x56f   : > { %v2523_v7 = vpop.xlane.xlu1 %824  ;;  %v835_v8 = vsel %vm834_vm10, %v830_v5, %v831_v6  ;;  %v921_v6 = vsel %vm920_vm0, %v2477_v56, %v2501_v28 }
 0x570   : > { %vm828_vm11 = vcmp.eq.f32.partialorder %v818_v1, %v2523_v7  ;;  %vm829_vm12 = vcmp.eq.f32.partialorder %v819_v2, %v2523_v7  ;;  %v837_v9 = vshra.s32 %v835_v8, 16  ;;  %v836_v16 = vand.u32 65535, %v835_v8 }
 0x571   : > { %v832_v10 = vsel %vm828_vm11, %v2473_v54, 1073741824  ;;  %v833_v11 = vsel %vm829_vm12, %v2475_v55, 1073741824 }
 0x572   : > { %v839_v12 = vcvt.s32.f32 %v837_v9  ;;  %vm850_vm13 = vcmp.lt.s32.totalorder %v832_v10, %v833_v11  ;;  %v838_v19 = vcvt.s32.f32 %v836_v16  ;;  %v924_v9 = vsel %vm923_vm1, %v921_v6, %v2517_v4  ;;  %v936_v4 = vld [vmem:[#allocation2 + $0x8] sm:$0xff] }
 0x573   : > { %v851_v13 = vsel %vm850_vm13, %v832_v10, %v833_v11 }
 0x574   : > { %840 = vmin.xlane.f32.xlu0 %v839_v12  ;;  %v853_v14 = vshra.s32 %v851_v13, 16  ;;  %v852_v20 = vand.u32 65535, %v851_v13 }
 0x576   : > { %v855_v15 = vcvt.s32.f32 %v853_v14  ;;  %v854_v24 = vcvt.s32.f32 %v852_v20 }
 0x578   : > { %856 = vmin.xlane.f32.xlu1 %v855_v15 }
 0x5fd   : > { %v841_v18 = vpop.xlane.xlu0 %840 }
 0x5fe   : > { %vm842_vm14 = vcmp.eq.f32.partialorder %v839_v12, %v841_v18  ;;  %v847_v26 = vcvt.f32.s32 %v841_v18 }
 0x5ff   : > { %v843_v21 = vsel %vm842_vm14, %v838_v19, inf  ;;  %vm926_vm14 = vcmask 23552  }
 0x600   : > { %844 = vmin.xlane.f32.xlu0 %v843_v21  ;;  %v848_v30 = vshll.u32 %v847_v26, 16 }
 0x601   : > { %v857_v22 = vpop.xlane.xlu1 %856 }
 0x602   : > { %vm858_vm15 = vcmp.eq.f32.partialorder %v855_v15, %v857_v22  ;;  %v863_v27 = vcvt.f32.s32 %v857_v22 }
 0x603   : > { %v859_v25 = vsel %vm858_vm15, %v854_v24, inf  ;;  %vm947_vm15 = vcmask 31744  }
 0x604   : > { %860 = vmin.xlane.f32.xlu1 %v859_v25  ;;  %v864_v34 = vshll.u32 %v863_v27, 16 }
 0x689   : > { %v845_v29 = vpop.xlane.xlu0 %844 }
 0x68a   : > { %v846_v32 = vcvt.f32.s32 %v845_v29 }
 0x68c   : > { %v849_v33 = vadd.s32 %v848_v30, %v846_v32  ;;  %v938_v30 = vld [vmem:[#allocation3] sm:$0xff] }
 0x68d   : > { %v861_v35 = vpop.xlane.xlu1 %860 }
 0x68e   : > { %v862_v37 = vcvt.f32.s32 %v861_v35  ;;  %vm866_vm2 = vcmp.eq.s32.totalorder %v2473_v54, %v849_v33  ;;  %vm867_vm3 = vcmp.eq.s32.totalorder %v2475_v55, %v849_v33  ;;  %v2534_v38 = vsel %vm923_vm1, %v929_v36, %v849_v33  ;;  %v937_v36 = vld [vmem:[#allocation3 + $0x8] sm:$0xff] }
 0x68f   : > { %v870_v39 = vsel %vm866_vm2, -inf, %v816_v61  ;;  %v871_v40 = vsel %vm867_vm3, -inf, %v817_v62  ;;  %vm956_vm2 = vcmask 64512  }
 0x690   : > { %v865_v41 = vadd.s32 %v864_v34, %v862_v37  ;;  %v874_v42 = vmax.f32 %v870_v39, %v871_v40 }
 0x692   : > { %875 = vmax.xlane.f32.xlu0 %v874_v42  ;;  %vm868_vm4 = vcmp.eq.s32.totalorder %v2473_v54, %v865_v41  ;;  %vm869_vm5 = vcmp.eq.s32.totalorder %v2475_v55, %v865_v41  ;;  %v2541_v17 = vsel %vm923_vm1, %v930_v43, %v865_v41 }
 0x693   : > { %v872_v44 = vsel %vm868_vm4, -inf, %v818_v1  ;;  %v873_v45 = vsel %vm869_vm5, -inf, %v819_v2 }
 0x694   : > { %v877_v46 = vmax.f32 %v872_v44, %v873_v45 }
 0x696   : > { %878 = vmax.xlane.f32.xlu1 %v877_v46 }
 0x71b   : > { %v876_v47 = vpop.xlane.xlu0 %875 }
 0x71c   : > { %vm880_vm6 = vcmp.eq.f32.partialorder %v870_v39, %v876_v47  ;;  %vm881_vm7 = vcmp.eq.f32.partialorder %v871_v40, %v876_v47  ;;  %v927_v11 = vsel %vm926_vm14, %v924_v9, %v876_v47 }
 0x71d   : > { %v884_v48 = vsel %vm880_vm6, %v2473_v54, 1073741824  ;;  %v885_v49 = vsel %vm881_vm7, %v2475_v55, 1073741824 }
 0x71e   : > { %vm888_vm8 = vcmp.lt.s32.totalorder %v884_v48, %v885_v49 }
 0x71f   : > { %v879_v23 = vpop.xlane.xlu1 %878  ;;  %v889_v50 = vsel %vm888_vm8, %v884_v48, %v885_v49 }
 0x720   : > { %vm882_vm9 = vcmp.eq.f32.partialorder %v872_v44, %v879_v23  ;;  %vm883_vm10 = vcmp.eq.f32.partialorder %v873_v45, %v879_v23  ;;  %v891_v51 = vshra.s32 %v889_v50, 16  ;;  %v890_v62 = vand.u32 65535, %v889_v50 }
 0x721   : > { %v886_v52 = vsel %vm882_vm9, %v2473_v54, 1073741824  ;;  %v887_v53 = vsel %vm883_vm10, %v2475_v55, 1073741824  ;;  %v922_v55 = vsel %vm920_vm0, %v2483_v59, %v2507_v31  ;;  %v935_v59 = vld [vmem:[#allocation2] sm:$0xff] }
 0x722   : > { %v893_v57 = vcvt.s32.f32 %v891_v51  ;;  %vm904_vm11 = vcmp.lt.s32.totalorder %v886_v52, %v887_v53  ;;  %v892_v0 = vcvt.s32.f32 %v890_v62  ;;  %v925_v8 = vsel %vm923_vm1, %v922_v55, %v2523_v7 }
 0x723   : > { %v905_v58 = vsel %vm904_vm11, %v886_v52, %v887_v53  ;;  %v928_v10 = vsel %vm926_vm14, %v925_v8, %v879_v23 }
 0x724   : > { %894 = vmin.xlane.f32.xlu0 %v893_v57  ;;  %v907_v60 = vshra.s32 %v905_v58, 16  ;;  %v906_v1 = vand.u32 65535, %v905_v58 }
 0x726   : > { %v909_v61 = vcvt.s32.f32 %v907_v60  ;;  %v908_v5 = vcvt.s32.f32 %v906_v1 }
 0x728   : > { %910 = vmin.xlane.f32.xlu1 %v909_v61 }
 0x7ad   : > { %v895_v63 = vpop.xlane.xlu0 %894 }
 0x7ae   : > { %vm896_vm12 = vcmp.eq.f32.partialorder %v893_v57, %v895_v63  ;;  %v901_v21 = vcvt.f32.s32 %v895_v63 }
 0x7af   : > { %v897_v2 = vsel %vm896_vm12, %v892_v0, inf }
 0x7b0   : > { %898 = vmin.xlane.f32.xlu0 %v897_v2  ;;  %v902_v25 = vshll.u32 %v901_v21, 16 }
 0x7b1   : > { %v911_v3 = vpop.xlane.xlu1 %910 }
 0x7b2   : > { %vm912_vm13 = vcmp.eq.f32.partialorder %v909_v61, %v911_v3  ;;  %v917_v16 = vcvt.f32.s32 %v911_v3 }
 0x7b3   : > { %v913_v54 = vsel %vm912_vm13, %v908_v5, inf }
 0x7b4   : > { %914 = vmin.xlane.f32.xlu1 %v913_v54  ;;  %v918_v19 = vshll.u32 %v917_v16, 16 }
 0x7c5   : > { %943 = vrot.lane.b32.xlu1 %v928_v10, %s2200_s25 }
 0x7c6   : > { %941 = vrot.lane.b32.xlu0 %v927_v11, %s2200_s25 }
 0x839   : > { %v899_v12 = vpop.xlane.xlu0 %898 }
 0x83a   : > { %v900_v24 = vcvt.f32.s32 %v899_v12 }
 0x83c   : > { %v903_v26 = vadd.s32 %v902_v25, %v900_v24 }
 0x83d   : > { %v915_v31 = vpop.xlane.xlu1 %914  ;;  %v942_v13 = vpop.permute.xlu0 %941 }
 0x83e   : > { %v2560_v56 = vsel %vm947_vm15, %v935_v59, %v942_v13  ;;  %v916_v18 = vcvt.f32.s32 %v915_v31  ;;  %v933_v27 = vsel %vm926_vm14, %v2534_v38, %v903_v26 }
 0x83f   : > { %v957_v28 = vsel %vm956_vm2, %v2560_v56, -inf }
 0x840   : > { %958 = vmax.xlane.f32.xlu1 %v957_v28  ;;  %v919_v20 = vadd.s32 %v918_v19, %v916_v18 }
 0x841   : > { %v944_v7 = vpop.permute.xlu1 %943 }
 0x842   : > { %v949_v14 = vsel %vm947_vm15, %v936_v4, %v944_v7  ;;  %v934_v22 = vsel %vm926_vm14, %v2541_v17, %v919_v20 }
 0x843   : > { %v960_v15 = vsel %vm956_vm2, %v949_v14, -inf }
 0x844   : > { %961 = vmax.xlane.f32.xlu0 %v960_v15 }
 0x851   : > { %952 = vrot.lane.b32.xlu1 %v934_v22, %s2200_s25 }
 0x85a   : > { %950 = vrot.lane.b32.xlu0 %v933_v27, %s2200_s25 }
 0x8c9   : > { %v2570_v29 = vpop.xlane.xlu1 %958 }
 0x8ca   : > { %vm963_vm4 = vcmp.eq.f32.partialorder %v2560_v56, %v2570_v29 }
 0x8cd   : > { %v953_v32 = vpop.permute.xlu1 %952  ;;  %v2572_v33 = vpop.xlane.xlu0 %961 }
 0x8ce   : > { %v2575_v34 = vsel %vm947_vm15, %v938_v30, %v953_v32  ;;  %vm964_vm3 = vcmp.eq.f32.partialorder %v949_v14, %v2572_v33 }
 0x8cf   : > { %v966_v35 = vsel %vm964_vm3, %v2575_v34, 1073741824 }
 0x8d0   : > { %v982_v37 = vsel %vm956_vm2, %v966_v35, 2147483647 }
 0x8d1   : > { %v951_v39 = vpop.permute.xlu0 %950  ;;  %v984_v40 = vshra.s32 %v982_v37, 16  ;;  %v983_v45 = vand.u32 65535, %v982_v37 }
 0x8d2   : > { %v2583_v38 = vsel %vm947_vm15, %v937_v36, %v951_v39 }
 0x8d3   : > { %v986_v41 = vcvt.s32.f32 %v984_v40  ;;  %v965_v42 = vsel %vm963_vm4, %v2583_v38, 1073741824  ;;  %v985_v47 = vcvt.s32.f32 %v983_v45 }
 0x8d4   : > { %v967_v43 = vsel %vm956_vm2, %v965_v42, 2147483647 }
 0x8d5   : > { %987 = vmin.xlane.f32.xlu0 %v986_v41  ;;  %v969_v17 = vshra.s32 %v967_v43, 16  ;;  %v968_v48 = vand.u32 65535, %v967_v43 }
 0x8d7   : > { %v971_v44 = vcvt.s32.f32 %v969_v17  ;;  %v970_v50 = vcvt.s32.f32 %v968_v48 }
 0x8d9   : > { %972 = vmin.xlane.f32.xlu1 %v971_v44 }
 0x95e   : > { %v988_v46 = vpop.xlane.xlu0 %987 }
 0x95f   : > { %vm989_vm5 = vcmp.eq.f32.partialorder %v986_v41, %v988_v46  ;;  %v994_v52 = vcvt.f32.s32 %v988_v46 }
 0x960   : > { %v990_v49 = vsel %vm989_vm5, %v985_v47, inf }
 0x961   : > { %991 = vmin.xlane.f32.xlu1 %v990_v49  ;;  %v995_v57 = vshll.u32 %v994_v52, 16 }
 0x962   : > { %v973_v23 = vpop.xlane.xlu1 %972 }
 0x963   : > { %vm974_vm6 = vcmp.eq.f32.partialorder %v971_v44, %v973_v23  ;;  %v979_v58 = vcvt.f32.s32 %v973_v23 }
 0x964   : > { %v975_v51 = vsel %vm974_vm6, %v970_v50, inf }
 0x965   : > { %976 = vmin.xlane.f32.xlu0 %v975_v51  ;;  %v980_v63 = vshll.u32 %v979_v58, 16 }
 0x9ea   : > { %v992_v53 = vpop.xlane.xlu1 %991 }
 0x9eb   : > { %v993_v60 = vcvt.f32.s32 %v992_v53 }
 0x9ed   : > { %v2587_v61 = vadd.s32 %v995_v57, %v993_v60 }
 0x9ee   : > { %v977_v62 = vpop.xlane.xlu0 %976 }
 0x9ef   : > { %v978_v0 = vcvt.f32.s32 %v977_v62  ;;  %vm998_vm7 = vcmp.eq.s32.totalorder %v2575_v34, %v2587_v61 }
 0x9f0   : > { %v1000_v1 = vsel %vm998_vm7, -inf, %v949_v14 }
 0x9f1   : > { %v2591_v2 = vadd.s32 %v980_v63, %v978_v0  ;;  %v1004_v3 = vsel %vm956_vm2, %v1000_v1, -inf }
 0x9f2   : > { %1005 = vmax.xlane.f32.xlu1 %v1004_v3 }
 0x9f3   : > { %vm997_vm8 = vcmp.eq.s32.totalorder %v2583_v38, %v2591_v2 }
 0x9f4   : > { %v999_v5 = vsel %vm997_vm8, -inf, %v2560_v56 }
 0x9f5   : > { %v1001_v54 = vsel %vm956_vm2, %v999_v5, -inf }
 0x9f6   : > { %1002 = vmax.xlane.f32.xlu0 %v1001_v54 }
 0xa7b   : > { %v2598_v55 = vpop.xlane.xlu1 %1005 }
 0xa7c   : > { %vm1008_vm9 = vcmp.eq.f32.partialorder %v1000_v1, %v2598_v55 }
 0xa7d   : > { %v1010_v6 = vsel %vm1008_vm9, %v2575_v34, 1073741824 }
 0xa7e   : > { %v1026_v8 = vsel %vm956_vm2, %v1010_v6, 2147483647 }
 0xa7f   : > { %v2603_v9 = vpop.xlane.xlu0 %1002  ;;  %v1028_v10 = vshra.s32 %v1026_v8, 16  ;;  %v1027_v56 = vand.u32 65535, %v1026_v8 }
 0xa80   : > { %vm1007_vm10 = vcmp.eq.f32.partialorder %v999_v5, %v2603_v9 }
 0xa81   : > { %v1009_v11 = vsel %vm1007_vm10, %v2583_v38, 1073741824  ;;  %v1030_v12 = vcvt.s32.f32 %v1028_v10  ;;  %v1029_v4 = vcvt.s32.f32 %v1027_v56 }
 0xa82   : > { %v1011_v59 = vsel %vm956_vm2, %v1009_v11, 2147483647 }
 0xa83   : > { %1031 = vmin.xlane.f32.xlu1 %v1030_v12  ;;  %v1013_v31 = vshra.s32 %v1011_v59, 16  ;;  %v1012_v7 = vand.u32 65535, %v1011_v59 }
 0xa85   : > { %v1015_v13 = vcvt.s32.f32 %v1013_v31  ;;  %v1014_v16 = vcvt.s32.f32 %v1012_v7 }
 0xa87   : > { %1016 = vmin.xlane.f32.xlu0 %v1015_v13 }
 0xb0c   : > { %v1032_v28 = vpop.xlane.xlu1 %1031 }
 0xb0d   : > { %vm1033_vm11 = vcmp.eq.f32.partialorder %v1030_v12, %v1032_v28  ;;  %v1038_v19 = vcvt.f32.s32 %v1032_v28  ;;  %v1130_v28 = vsel %vm920_vm0, %v2572_v33, %v2598_v55 }
 0xb0e   : > { %v1034_v14 = vsel %vm1033_vm11, %v1029_v4, inf }
 0xb0f   : > { %1035 = vmin.xlane.f32.xlu1 %v1034_v14  ;;  %v1039_v21 = vshll.u32 %v1038_v19, 16 }
 0xb10   : > { %v1017_v15 = vpop.xlane.xlu0 %1016 }
 0xb11   : > { %vm1018_vm12 = vcmp.eq.f32.partialorder %v1015_v13, %v1017_v15  ;;  %v1023_v22 = vcvt.f32.s32 %v1017_v15 }
 0xb12   : > { %v1019_v18 = vsel %vm1018_vm12, %v1014_v16, inf  ;;  %v1129_v16 = vsel %vm920_vm0, %v2570_v29, %v2603_v9 }
 0xb13   : > { %1020 = vmin.xlane.f32.xlu0 %v1019_v18  ;;  %v1024_v27 = vshll.u32 %v1023_v22, 16 }
 0xb98   : > { %v1036_v20 = vpop.xlane.xlu1 %1035 }
 0xb99   : > { %v1037_v24 = vcvt.f32.s32 %v1036_v20 }
 0xb9b   : > { %v1040_v25 = vadd.s32 %v1039_v21, %v1037_v24 }
 0xb9c   : > { %v1021_v26 = vpop.xlane.xlu0 %1020 }
 0xb9d   : > { %v1022_v30 = vcvt.f32.s32 %v1021_v26  ;;  %vm1042_vm13 = vcmp.eq.s32.totalorder %v2575_v34, %v1040_v25 }
 0xb9e   : > { %v1044_v32 = vsel %vm1042_vm13, -inf, %v1000_v1 }
 0xb9f   : > { %v1025_v35 = vadd.s32 %v1024_v27, %v1022_v30  ;;  %v1048_v36 = vsel %vm956_vm2, %v1044_v32, -inf }
 0xba0   : > { %1049 = vmax.xlane.f32.xlu1 %v1048_v36 }
 0xba1   : > { %vm1041_vm3 = vcmp.eq.s32.totalorder %v2583_v38, %v1025_v35  ;;  %v1135_v31 = vsel %vm920_vm0, %v2591_v2, %v1025_v35 }
 0xba2   : > { %v1043_v37 = vsel %vm1041_vm3, -inf, %v999_v5  ;;  %v1136_v5 = vsel %vm920_vm0, %v2587_v61, %v1040_v25 }
 0xba3   : > { %v1045_v39 = vsel %vm956_vm2, %v1043_v37, -inf }
 0xba4   : > { %1046 = vmax.xlane.f32.xlu0 %v1045_v39 }
 0xc29   : > { %v1050_v40 = vpop.xlane.xlu1 %1049 }
 0xc2a   : > { %vm1052_vm4 = vcmp.eq.f32.partialorder %v1044_v32, %v1050_v40  ;;  %v1132_v4 = vsel %vm923_vm1, %v1130_v28, %v1050_v40 }
 0xc2b   : > { %v1054_v41 = vsel %vm1052_vm4, %v2575_v34, 1073741824 }
 0xc2c   : > { %v1070_v42 = vsel %vm956_vm2, %v1054_v41, 2147483647 }
 0xc2d   : > { %v1047_v43 = vpop.xlane.xlu0 %1046  ;;  %v1072_v17 = vshra.s32 %v1070_v42, 16  ;;  %v1071_v49 = vand.u32 65535, %v1070_v42 }
 0xc2e   : > { %vm1051_vm5 = vcmp.eq.f32.partialorder %v1043_v37, %v1047_v43  ;;  %v1131_v19 = vsel %vm923_vm1, %v1129_v16, %v1047_v43 }
 0xc2f   : > { %v1053_v44 = vsel %vm1051_vm5, %v2583_v38, 1073741824  ;;  %v1074_v45 = vcvt.s32.f32 %v1072_v17  ;;  %v1073_v50 = vcvt.s32.f32 %v1071_v49 }
 0xc30   : > { %v1055_v46 = vsel %vm956_vm2, %v1053_v44, 2147483647 }
 0xc31   : > { %1075 = vmin.xlane.f32.xlu1 %v1074_v45  ;;  %v1057_v47 = vshra.s32 %v1055_v46, 16  ;;  %v1056_v51 = vand.u32 65535, %v1055_v46 }
 0xc33   : > { %v1059_v48 = vcvt.s32.f32 %v1057_v47  ;;  %v1058_v57 = vcvt.s32.f32 %v1056_v51 }
 0xc35   : > { %1060 = vmin.xlane.f32.xlu0 %v1059_v48 }
 0xcba   : > { %v1076_v23 = vpop.xlane.xlu1 %1075 }
 0xcbb   : > { %vm1077_vm6 = vcmp.eq.f32.partialorder %v1074_v45, %v1076_v23  ;;  %v1082_v60 = vcvt.f32.s32 %v1076_v23 }
 0xcbc   : > { %v1078_v52 = vsel %vm1077_vm6, %v1073_v50, inf }
 0xcbd   : > { %1079 = vmin.xlane.f32.xlu1 %v1078_v52  ;;  %v1083_v63 = vshll.u32 %v1082_v60, 16 }
 0xcbe   : > { %v1061_v53 = vpop.xlane.xlu0 %1060 }
 0xcbf   : > { %vm1062_vm7 = vcmp.eq.f32.partialorder %v1059_v48, %v1061_v53  ;;  %v1067_v0 = vcvt.f32.s32 %v1061_v53 }
 0xcc0   : > { %v1063_v58 = vsel %vm1062_vm7, %v1058_v57, inf }
 0xcc1   : > { %1064 = vmin.xlane.f32.xlu0 %v1063_v58  ;;  %v1068_v6 = vshll.u32 %v1067_v0, 16 }
 0xd46   : > { %v1080_v62 = vpop.xlane.xlu1 %1079 }
 0xd47   : > { %v1081_v1 = vcvt.f32.s32 %v1080_v62 }
 0xd49   : > { %v1084_v3 = vadd.s32 %v1083_v63, %v1081_v1 }
 0xd4a   : > { %v1065_v54 = vpop.xlane.xlu0 %1064 }
 0xd4b   : > { %v1138_v8 = vsel %vm923_vm1, %v1136_v5, %v1084_v3  ;;  %v1066_v10 = vcvt.f32.s32 %v1065_v54  ;;  %vm1086_vm8 = vcmp.eq.s32.totalorder %v2575_v34, %v1084_v3 }
 0xd4c   : > { %v1088_v11 = vsel %vm1086_vm8, -inf, %v1044_v32 }
 0xd4d   : > { %v1069_v12 = vadd.s32 %v1068_v6, %v1066_v10  ;;  %v1092_v59 = vsel %vm956_vm2, %v1088_v11, -inf }
 0xd4e   : > { %1093 = vmax.xlane.f32.xlu1 %v1092_v59 }
 0xd4f   : > { %v1137_v13 = vsel %vm923_vm1, %v1135_v31, %v1069_v12  ;;  %vm1085_vm9 = vcmp.eq.s32.totalorder %v2583_v38, %v1069_v12 }
 0xd50   : > { %v1087_v61 = vsel %vm1085_vm9, -inf, %v1043_v37 }
 0xd51   : > { %v1089_v56 = vsel %vm956_vm2, %v1087_v61, -inf }
 0xd52   : > { %1090 = vmax.xlane.f32.xlu0 %v1089_v56 }
 0xdd7   : > { %v1094_v7 = vpop.xlane.xlu1 %1093 }
 0xdd8   : > { %vm1096_vm10 = vcmp.eq.f32.partialorder %v1088_v11, %v1094_v7  ;;  %v1134_v14 = vsel %vm926_vm14, %v1132_v4, %v1094_v7 }
 0xdd9   : > { %v1098_v2 = vsel %vm1096_vm10, %v2575_v34, 1073741824  ;;  %v1142_v15 = vsel %vm947_vm15, %v1134_v14, -inf }
 0xdda   : > { %1146 = vst [vmem:[#allocation2 + $0x8] sm:$0xff] %v1142_v15  ;;  %v1114_v18 = vsel %vm956_vm2, %v1098_v2, 2147483647 }
 0xddb   : > { %v1091_v33 = vpop.xlane.xlu0 %1090  ;;  %v1116_v55 = vshra.s32 %v1114_v18, 16  ;;  %v1115_v25 = vand.u32 65535, %v1114_v18 }
 0xddc   : > { %vm1095_vm11 = vcmp.eq.f32.partialorder %v1087_v61, %v1091_v33  ;;  %v1133_v20 = vsel %vm926_vm14, %v1131_v19, %v1091_v33 }
 0xddd   : > { %v1097_v21 = vsel %vm1095_vm11, %v2583_v38, 1073741824  ;;  %v1141_v34 = vsel %vm947_vm15, %v1133_v20, -inf  ;;  %v1118_v22 = vcvt.s32.f32 %v1116_v55  ;;  %v1117_v27 = vcvt.s32.f32 %v1115_v25 }
 0xdde   : > { %1145 = vst [vmem:[#allocation2] sm:$0xff] %v1141_v34  ;;  %v1099_v24 = vsel %vm956_vm2, %v1097_v21, 2147483647 }
 0xddf   : > { %1119 = vmin.xlane.f32.xlu1 %v1118_v22  ;;  %v1101_v29 = vshra.s32 %v1099_v24, 16  ;;  %v1100_v30 = vand.u32 65535, %v1099_v24 }
 0xde1   : > { %v1103_v9 = vcvt.s32.f32 %v1101_v29  ;;  %v1102_v36 = vcvt.s32.f32 %v1100_v30 }
 0xde3   : > { %1104 = vmin.xlane.f32.xlu0 %v1103_v9 }
 0xe68   : > { %v1120_v26 = vpop.xlane.xlu1 %1119 }
 0xe69   : > { %vm1121_vm0 = vcmp.eq.f32.partialorder %v1118_v22, %v1120_v26  ;;  %v1126_v37 = vcvt.f32.s32 %v1120_v26 }
 0xe6a   : > { %v1122_v32 = vsel %vm1121_vm0, %v1117_v27, inf }
 0xe6b   : > { %1123 = vmin.xlane.f32.xlu1 %v1122_v32  ;;  %v1127_v40 = vshll.u32 %v1126_v37, 16 }
 0xe6c   : > { %v1105_v35 = vpop.xlane.xlu0 %1104 }
 0xe6d   : > { %vm1106_vm1 = vcmp.eq.f32.partialorder %v1103_v9, %v1105_v35  ;;  %v1111_v41 = vcvt.f32.s32 %v1105_v35 }
 0xe6e   : > { %v1107_v38 = vsel %vm1106_vm1, %v1102_v36, inf }
 0xe6f   : > { %1108 = vmin.xlane.f32.xlu0 %v1107_v38  ;;  %v1112_v44 = vshll.u32 %v1111_v41, 16 }
 0xef4   : > { %v1124_v39 = vpop.xlane.xlu1 %1123 }
 0xef5   : > { %v1125_v42 = vcvt.f32.s32 %v1124_v39 }
 0xef7   : > { %v1128_v43 = vadd.s32 %v1127_v40, %v1125_v42 }
 0xef8   : > { %v1109_v17 = vpop.xlane.xlu0 %1108 }
 0xef9   : > { %v1140_v45 = vsel %vm926_vm14, %v1138_v8, %v1128_v43  ;;  %v1110_v46 = vcvt.f32.s32 %v1109_v17 }
 0xefa   : > { %v1144_v47 = vsel %vm947_vm15, %v1140_v45, 4294967295 }
 0xefb   : > { %1148 = vst [vmem:[#allocation3] sm:$0xff] %v1144_v47  ;;  %v1113_v48 = vadd.s32 %v1112_v44, %v1110_v46 }
 0xefd   : > { %v1139_v49 = vsel %vm926_vm14, %v1137_v13, %v1113_v48 }
 0xefe   : > { %v1143_v23 = vsel %vm947_vm15, %v1139_v49, 4294967295 }
 0xeff   : > { %1147 = vst [vmem:[#allocation3 + $0x8] sm:$0xff] %v1143_v23 }
 0xf00 PF: > { %p1768_p1 = scmp.lt.s32.totalorder %s2180_s11, 2 }
 0xf01   : > { %s1769_s20 = sadd.s32 (!%p1768_p1), 4294967294, %s2180_s11 }
 0xf02   : > { %1152 = sbr.rel (%p1768_p1) target bundleno = 4219 (0x107b), region = 64  ;;  %s1770_s15 = sshll.u32 (!%p1768_p1), %s1769_s20, 8 }
 0xf07   : > { %v1163_v50 = vld [vmem:[#allocation3 + $0x8] sm:$0xff]  ;;  %v2201_v51 = vmov 1   ;;  %v2202_v52 = vmov 0   ;;  %v1164_v53 = vld [vmem:[#allocation3] sm:$0xff]  ;;  %v1161_v57 = vld [vmem:[#allocation2] sm:$0xff]  ;;  %v2203_v54 = vmov 2   ;;  %v1154_v16 = vlaneseq }
 0xf08   : > { %1972 = vset.pattern.permute.xlu1 %v2201_v51  ;;  %1971 = vset.pattern.permute.xlu0 %v2202_v52  ;;  %v1162_v58 = vld [vmem:[#allocation2 + $0x8] sm:$0xff]  ;;  %v1980_v60 = vld [vmem:[%s2432_s8 + $0x78] sm:$0xff]   ;;  %v1982_v63 = vld [vmem:[%s2432_s8 + $0x70] sm:$0xff]   ;;  %v2204_v11 = vmov 3   ;;  %v1158_v34 = vstv %s1770_s15 }
 0xf09   : > { %1194 = vperm.xlu1 %1972, %v1163_v50   ;;  %1166 = vperm.xlu0 %1971, %v1163_v50   ;;  %v1981_v62 = vld [vmem:[%s2432_s8 + $0x38] sm:$0xff]   ;;  %v1983_v0 = vld [vmem:[%s2432_s8 + $0x30] sm:$0xff]   ;;  %v1984_v1 = vld [vmem:[%s2432_s8 + $0x68] sm:$0xff]   ;;  %v1155_v19 = vand.u32 127, %v1154_v16 }
 0xf0a   : > { %1817 = vmatprep.subr.bf16.mxu0 %v1980_v60  ;;  %v1985_v3 = vld [vmem:[%s2432_s8 + $0x28] sm:$0xff]   ;;  %v1986_v5 = vld [vmem:[%s2432_s8 + $0x60] sm:$0xff]   ;;  %v1988_v8 = vld [vmem:[%s2432_s8 + $0x58] sm:$0xff]  }
 0xf0b   : > { %1818 = vmatpush3.bf16.msra.mxu0 %v1981_v62  ;;  %v1987_v6 = vld [vmem:[%s2432_s8 + $0x20] sm:$0xff]   ;;  %v1989_v10 = vld [vmem:[%s2432_s8 + $0x18] sm:$0xff]   ;;  %v1990_v12 = vld [vmem:[%s2432_s8 + $0x50] sm:$0xff]   ;;  %v1156_v20 = vadd.s32 128, %v1155_v19  ;;  %v1159_v24 = vadd.s32 %v1158_v34, %v1155_v19 }
 0xf0c   : > { %1819 = vmatprep.subr.bf16.mxu0 %v1982_v63  ;;  %v1991_v59 = vld [vmem:[%s2432_s8 + $0x10] sm:$0xff]   ;;  %v1992_v31 = vld [vmem:[%s2432_s8 + $0x48] sm:$0xff]   ;;  %v1994_v61 = vld [vmem:[%s2432_s8 + $0x40] sm:$0xff]  }
 0xf0d   : > { %1197 = vperm.xlu1 %1972, %v1164_v53   ;;  %1169 = vperm.xlu0 %1971, %v1164_v53   ;;  %v1993_v13 = vld [vmem:[%s2432_s8 + $0x8] sm:$0xff]   ;;  %v1995_v56 = vld [vmem:[%s2432_s8] sm:$0xff]   ;;  %v1160_v29 = vadd.s32 %v1158_v34, %v1156_v20 }
 0xf0f   : > { %1820 = vmatpush3.bf16.msra.mxu0 %v1983_v0 }
 0xf10   : > { %1821 = vmatprep.subr.bf16.mxu0 %v1984_v1 }
 0xf11   : > { %1973 = vset.pattern.permute.xlu1 %v2202_v52  ;;  %1177 = vperm.xlu0 %1971, %v1161_v57  }
 0xf12   : > { %1182 = vperm.xlu1 %1973, %v1162_v58  }
 0xf13   : > { %1822 = vmatpush3.bf16.msra.mxu0 %v1985_v3 }
 0xf14   : > { %1823 = vmatprep.subr.bf16.mxu0 %v1986_v5 }
 0xf15   : > { %1974 = vset.pattern.permute.xlu0 %v2201_v51 }
 0xf16   : > { %1975 = vset.pattern.permute.xlu1 %v2201_v51  ;;  %1204 = vperm.xlu0 %1974, %v1161_v57  }
 0xf17   : > { %1208 = vperm.xlu1 %1975, %v1162_v58   ;;  %1824 = vmatpush3.bf16.msra.mxu0 %v1987_v6 }
 0xf18   : > { %1825 = vmatprep.subr.bf16.mxu0 %v1988_v8 }
 0xf1a   : > { %1977 = vset.pattern.permute.xlu0 %v2203_v54 }
 0xf1b   : > { %1976 = vset.pattern.permute.xlu1 %v2203_v54  ;;  %1223 = vperm.xlu0 %1977, %v1164_v53   ;;  %v1271_v54 = vld [vmem:[#allocation4 + $0x8] sm:$0xff] }
 0xf1c   : > { %1220 = vperm.xlu1 %1976, %v1163_v50   ;;  %1826 = vmatpush3.bf16.msra.mxu0 %v1989_v10 }
 0xf1d   : > { %1827 = vmatprep.subr.bf16.mxu0 %v1990_v12  ;;  %v1272_v12 = vld [vmem:[#allocation4] sm:$0xff] }
 0xf1f   : > { %1978 = vset.pattern.permute.xlu0 %v2204_v11 }
 0xf20   : > { %1230 = vperm.xlu1 %1976, %v1161_v57   ;;  %1246 = vperm.xlu0 %1978, %v1163_v50  }
 0xf21   : > { %1828 = vmatpush3.bf16.msra.mxu0 %v1991_v59 }
 0xf22   : > { %1829 = vmatprep.subr.bf16.mxu0 %v1992_v31 }
 0xf24   : > { %1234 = vperm.xlu1 %1976, %v1162_v58   ;;  %1260 = vperm.xlu0 %1978, %v1162_v58  }
 0xf25   : > { %1830 = vmatpush3.bf16.msra.mxu0 %v1993_v13 }
 0xf26   : > { %1831 = vmatprep.subr.bf16.mxu0 %v1994_v61 }
 0xf28   : > { %1979 = vset.pattern.permute.xlu1 %v2204_v11 }
 0xf29   : > { %1249 = vperm.xlu1 %1979, %v1164_v53   ;;  %1832 = vmatpush3.bf16.msra.mxu0 %v1995_v56 }
 0xf2d   : > { %1256 = vperm.xlu1 %1979, %v1161_v57  }
 0xf84   : > { %v1195_v28 = vpop.permute.xlu1 %1194  ;;  %v1167_v4 = vpop.permute.xlu0 %1166 }
 0xf85   : > { %vm1171_vm14 = vcmp.eq.s32.totalorder %v1159_v24, %v1167_v4  ;;  %vm1172_vm15 = vcmp.eq.s32.totalorder %v1160_v29, %v1167_v4  ;;  %vm1199_vm2 = vcmp.eq.s32.totalorder %v1159_v24, %v1195_v28  ;;  %vm1200_vm12 = vcmp.eq.s32.totalorder %v1160_v29, %v1195_v28 }
 0xf88   : > { %v1198_v7 = vpop.permute.xlu1 %1197  ;;  %v1170_v14 = vpop.permute.xlu0 %1169 }
 0xf89   : > { %vm1201_vm13 = vcmp.eq.s32.totalorder %v1159_v24, %v1198_v7  ;;  %vm1202_vm3 = vcmp.eq.s32.totalorder %v1160_v29, %v1198_v7  ;;  %vm1173_vm4 = vcmp.eq.s32.totalorder %v1159_v24, %v1170_v14  ;;  %vm1174_vm5 = vcmp.eq.s32.totalorder %v1160_v29, %v1170_v14 }
 0xf8c   : > { %v1178_v15 = vpop.permute.xlu0 %1177 }
 0xf8d   : > { %v1183_v2 = vpop.permute.xlu1 %1182  ;;  %v1185_v26 = vsel %vm1171_vm14, %v1178_v15, 0.0  ;;  %v1186_v27 = vsel %vm1172_vm15, %v1178_v15, 0.0 }
 0xf8e   : > { %v1187_v38 = vsel %vm1173_vm4, %v1183_v2, 0.0  ;;  %v1188_v37 = vsel %vm1174_vm5, %v1183_v2, 0.0 }
 0xf91   : > { %v1205_v33 = vpop.permute.xlu0 %1204 }
 0xf92   : > { %v1209_v18 = vpop.permute.xlu1 %1208  ;;  %v1211_v30 = vsel %vm1199_vm2, %v1205_v33, 0.0  ;;  %v1212_v32 = vsel %vm1200_vm12, %v1205_v33, 0.0 }
 0xf93   : > { %v1213_v35 = vsel %vm1201_vm13, %v1209_v18, 0.0  ;;  %v1214_v36 = vsel %vm1202_vm3, %v1209_v18, 0.0  ;;  %v1215_v44 = vadd.f32 %v1211_v30, %v1185_v26  ;;  %v1216_v45 = vadd.f32 %v1212_v32, %v1186_v27 }
 0xf94   : > { %v1217_v46 = vadd.f32 %v1213_v35, %v1187_v38  ;;  %v1218_v47 = vadd.f32 %v1214_v36, %v1188_v37 }
 0xf96   : > { %v1224_v21 = vpop.permute.xlu0 %1223 }
 0xf97   : > { %v1221_v55 = vpop.permute.xlu1 %1220  ;;  %vm1227_vm6 = vcmp.eq.s32.totalorder %v1159_v24, %v1224_v21  ;;  %vm1228_vm7 = vcmp.eq.s32.totalorder %v1160_v29, %v1224_v21 }
 0xf98   : > { %vm1225_vm8 = vcmp.eq.s32.totalorder %v1159_v24, %v1221_v55  ;;  %vm1226_vm9 = vcmp.eq.s32.totalorder %v1160_v29, %v1221_v55 }
 0xf9b   : > { %v1231_v22 = vpop.permute.xlu1 %1230  ;;  %v1247_v9 = vpop.permute.xlu0 %1246 }
 0xf9c   : > { %v1237_v39 = vsel %vm1225_vm8, %v1231_v22, 0.0  ;;  %v1238_v40 = vsel %vm1226_vm9, %v1231_v22, 0.0  ;;  %vm1251_vm0 = vcmp.eq.s32.totalorder %v1159_v24, %v1247_v9  ;;  %vm1252_vm1 = vcmp.eq.s32.totalorder %v1160_v29, %v1247_v9 }
 0xf9d   : > { %v1241_v23 = vadd.f32 %v1237_v39, %v1215_v44  ;;  %v1242_v50 = vadd.f32 %v1238_v40, %v1216_v45 }
 0xf9f   : > { %v1235_v25 = vpop.permute.xlu1 %1234  ;;  %v1261_v42 = vpop.permute.xlu0 %1260 }
 0xfa0   : > { %v1239_v43 = vsel %vm1227_vm6, %v1235_v25, 0.0  ;;  %v1240_v17 = vsel %vm1228_vm7, %v1235_v25, 0.0 }
 0xfa1   : > { %v1243_v51 = vadd.f32 %v1239_v43, %v1217_v46  ;;  %v1244_v52 = vadd.f32 %v1240_v17, %v1218_v47 }
 0xfa4   : > { %v1250_v41 = vpop.permute.xlu1 %1249 }
 0xfa5   : > { %vm1253_vm10 = vcmp.eq.s32.totalorder %v1159_v24, %v1250_v41  ;;  %vm1254_vm11 = vcmp.eq.s32.totalorder %v1160_v29, %v1250_v41 }
 0xfa6   : > { %v1265_v48 = vsel %vm1253_vm10, %v1261_v42, 0.0  ;;  %v1266_v49 = vsel %vm1254_vm11, %v1261_v42, 0.0 }
 0xfa7   : > { %v1269_v60 = vadd.f32 %v1265_v48, %v1243_v51  ;;  %v1270_v62 = vadd.f32 %v1266_v49, %v1244_v52 }
 0xfa8   : > { %v1257_v53 = vpop.permute.xlu1 %1256 }
 0xfa9   : > { %v1263_v57 = vsel %vm1251_vm0, %v1257_v53, 0.0  ;;  %v1264_v58 = vsel %vm1252_vm1, %v1257_v53, 0.0 }
 0xfaa   : > { %v1267_v63 = vadd.f32 %v1263_v57, %v1241_v23  ;;  %v1268_v0 = vadd.f32 %v1264_v58, %v1242_v50 }
 0xfac   : > { %v1273_v1 = vpack.c.bf16 %v1269_v60, %v1267_v63  ;;  %v1274_v3 = vpack.c.bf16 %v1270_v62, %v1268_v0 }
 0xfae   : > { %1435 = vmatprep.mubr.bf16.mxu0 %v1274_v3 }
 0xfaf   : > { %1436 = vmatmul.mubr.bf16.vlgmr.msra.gmra.mxu0 %v1273_v1 }
0x106f   : > { %v1833_v5 = vpop.f32.mrf.mxu0 }
0x1071   : > { %v1834_v6 = vpop.f32.mrf.mxu0 }
0x1072   : > { %v1835_v8 = vadd.f32 %v1834_v6, %v1833_v5 }
0x1073   : > { %v1836_v10 = vpop.f32.mrf.mxu0 }
0x1074   : > { %v1444_v11 = vadd.f32 %v1835_v8, %v1271_v54 }
0x1075   : > { %v1837_v59 = vpop.f32.mrf.mxu0 }
0x1076   : > { %1446 = vst [vmem:[#allocation4 + $0x8] sm:$0xff] %v1444_v11  ;;  %v1838_v31 = vadd.f32 %v1837_v59, %v1836_v10 }
0x1078   : > { %v1445_v13 = vadd.f32 %v1838_v31, %v1272_v12 }
0x107a   : > { %1447 = vst [vmem:[#allocation4] sm:$0xff] %v1445_v13 }
0x107b PF: > { %p1787_p9 = scmp.ne.s32.totalorder %s2180_s11, 3 }
0x107c   : > { %s2762_s8 = sld [smem:[#allocation20_spill]] (!%p1787_p9) }
0x107d   : > { %1451 = sbr.rel (%p1787_p9) target bundleno = 4258 (0x10a2), region = 68  ;;  %s2763_s17 = sld [smem:[#allocation21_spill]] (!%p1787_p9) }
0x107e   : > { %s2764_s19 = sld [smem:[#allocation22_spill]] (!%p1787_p9) }
0x1082   : > { %v1452_v61 = vld [vmem:[#allocation5] sm:$0xff]  ;;  %v1454_v56 = vld [vmem:[%s2726_s4] sm:$0x1]  ;;  %v1458_v28 = vlaneseq  ;;  %v1453_v7 = vld [vmem:[#allocation5 + $0x8] sm:$0xff]  ;;  %vm1518_vm14 = vcmask 1040384   ;;  %vm1520_vm15 = vcmask 1041408  }
0x1083   : > { %v1509_v4 = vmul.f32 %v1452_v61, %v1452_v61  ;;  %v1466_v14 = vld [vmem:[#allocation2] sm:$0xff]  ;;  %v1455_v2 = vunpack.c.l.bf16 %v1454_v56  ;;  %v1502_v16 = vadd.f32 %v1453_v7, %v1452_v61  ;;  %v1510_v18 = vmul.f32 %v1453_v7, %v1453_v7  ;;  %v1467_v19 = vld [vmem:[#allocation2 + $0x8] sm:$0xff]  ;;  %v1470_v33 = vld [vmem:[#allocation3 + $0x8] sm:$0xff] }
0x1084   : > { %v1459_v15 = vshrl.u32 %v1458_v28, 7  ;;  %1468 = vst [vmem:[%s2762_s8] sm:$0xff] %v1466_v14  ;;  %v1471_v55 = vld [vmem:[#allocation3] sm:$0xff]  ;;  %1469 = vst [vmem:[%s2762_s8 + $0x8] sm:$0xff] %v1467_v19  ;;  %v1456_v22 = vld [vmem:[#allocation4 + $0x8] sm:$0xff]  ;;  %vm1522_vm2 = vcmask 1042432  }
0x1085   : > { %1472 = vst [vmem:[%s2763_s17] sm:$0xff] %v1470_v33  ;;  %1473 = vst [vmem:[%s2763_s17 + $0x8] sm:$0xff] %v1471_v55  ;;  %v1503_v21 = vrot.slane %v1502_v16, 4  ;;  %v1511_v34 = vadd.f32 %v1510_v18, %v1509_v4  ;;  %v1457_v24 = vld [vmem:[#allocation4] sm:$0xff] }
0x1086   : > { %v1460_v20 = vsub.s32 0, %v1459_v15 }
0x1087   : > { %v1512_v9 = vrot.slane %v1511_v34, 4  ;;  %v1504_v27 = vadd.f32 %v1503_v21, %v1502_v16 }
0x1088   : > { %v1461_v29 = vrot.slane %v1455_v2, %v1460_v20 }
0x1089   : > { %v1513_v30 = vadd.f32 %v1512_v9, %v1511_v34  ;;  %v1505_v37 = vrot.slane %v1504_v27, 2 }
0x108a   : > { %v1462_v25 = vadd.f32 %v1461_v29, %v1456_v22  ;;  %v1463_v26 = vadd.f32 %v1461_v29, %v1457_v24 }
0x108b   : > { %v1514_v39 = vrot.slane %v1513_v30, 2  ;;  %v1506_v42 = vadd.f32 %v1505_v37, %v1504_v27 }
0x108c   : > { %1464 = vst [vmem:[#allocation11] sm:$0xff] %v1462_v25  ;;  %v1487_v32 = vsub.f32 %v1462_v25, %v1452_v61  ;;  %1465 = vst [vmem:[#allocation11 + $0x8] sm:$0xff] %v1463_v26  ;;  %v1488_v35 = vsub.f32 %v1463_v26, %v1453_v7 }
0x108d   : > { %v1515_v43 = vadd.f32 %v1514_v39, %v1513_v30  ;;  %v1507_v45 = vrot.slane %v1506_v42, 1 }
0x108e   : > { %v1493_v36 = vmul.f32 %v1487_v32, %v1487_v32  ;;  %v1494_v38 = vmul.f32 %v1488_v35, %v1488_v35 }
0x108f   : > { %v1516_v46 = vrot.slane %v1515_v43, 1  ;;  %v1508_v49 = vadd.f32 %v1507_v45, %v1506_v42 }
0x1090   : > { %v1495_v40 = vadd.f32 %v1494_v38, %v1493_v36 }
0x1091   : > { %v1517_v23 = vadd.f32 %v1516_v46, %v1515_v43 }
0x1092   : > { %v1496_v41 = vrot.slane %v1495_v40, 4 }
0x1094   : > { %v1497_v17 = vadd.f32 %v1496_v41, %v1495_v40 }
0x1096   : > { %v1498_v44 = vrot.slane %v1497_v17, 2 }
0x1098   : > { %v1499_v47 = vadd.f32 %v1498_v44, %v1497_v17 }
0x109a   : > { %v1500_v48 = vrot.slane %v1499_v47, 1 }
0x109c   : > { %v1501_v50 = vadd.f32 %v1500_v48, %v1499_v47 }
0x109e   : > { %v1519_v51 = vsel %vm1518_vm14, %v1501_v50, %v1508_v49 }
0x109f   : > { %v1521_v52 = vsel %vm1520_vm15, %v1519_v51, %v1517_v23 }
0x10a0   : > { %v1523_v53 = vsel %vm1522_vm2, %v1521_v52, 0.0 }
0x10a1   : > { %1524 = vst [vmem:[%s2764_s19] sm:$0xff] %v1523_v53 }
0x10a2 PF: > { %p1865_p11 = scmp.eq.s32.totalorder %s2343_s21, 3  ;;  %s2205_s23 = smov [#allocation11]  }
0x10a3   : > { %s1548_s25 = sshll.u32 %s2205_s23, 4  ;;  %s1549_s25 = int_to_ptr.vmem [resolvable:$true] %s1548_s25 }
0x10a4   : > { %s2078_s20 = scalar_lea.vmem %s1549_s25, 256  ;;  %p2085_p2 = scmp.lt.s32.totalorder %s1549_s25, %s1549_s25 }
0x10a5   : > { %p2079_p13 = scmp.ne.s32.totalorder %s1549_s25, %s2078_s20  ;;  %p2086_p7 = scmp.lt.s32.totalorder %s2078_s20, %s2078_s20 }
0x10a7   : > { %p2080_p3 = pnand %p2079_p13, %p1865_p11  ;;  %p2087_p4 = por %p2086_p7, %p2085_p2 }
0x10a9   : > { %p2081_p6 = pneg %p2080_p3 }
0x10ab   : > { %p2088_p0 = pnand %p2087_p4, %p2081_p6 }
0x10ad   : > { %2091 = shalt.err (!%p2088_p0)
}
0x10ae   : > { %s2206_s15 = smov 128   ;;  %s2207_s27 = smov 8  }
0x10af   : > { %s2765_s6 = sld [smem:[#allocation19_spill]] }
0x10b5   : > { %1848 = dma.vmem_to_hbm [thread:$0]  (%p1865_p11), %s1549_s25, 256, %s2765_s6, [#allocation7], %s2206_s15, %s2206_s15, %s2207_s27  }
0x10b6   : > { %2151 = dma.done.wait (%p1865_p11), [#allocation7], 256  }
0x10b7   : > { %2153 = vsyncadd (%p1865_p11), [#allocation7], 4294967040 }
0x10b8 PF: > { %s24_s13 = sadd.s32 1, %s2188_s13   ;;  %s2766_s11 = sld [smem:[#allocation16_spill]] }
0x10b9   : > { %p21_p5 = scmp.ge.s32.totalorder %s24_s13, 6   ;;  %s2767_s12 = sld [smem:[#allocation17_spill]] }
0x10ba   : > { %s2768_s27 = smov %s2160_s28  ;;  %s2769_s28 = smov %s2164_s29 }
0x10bb   : > { %s2770_s29 = smov %s2401_s26  ;;  %s2771_s30 = smov %s2172_s9 }
0x10bc   : > { %s2772_s9 = smov %s2176_s10  ;;  %s2773_s10 = smov %s2319_s24 }
0x10bd   :  { %23 = sbr.rel (!%p21_p5) target bundleno = 14 (0xe), region = 150 }
0x10c2   :  { %1598 = vsyncpa [#allocation6], 1 }
0x10c3   :  { %1600 = vsyncpa [#allocation6 + $0x1], 1 }
0x10c4   :  { %1601 = vsyncpa [#allocation9], 1 }
0x10c5   :  { %1603 = vsyncpa [#allocation9 + $0x1], 1 }
0x10c6   :  { %1604 = vsyncpa [#allocation7], 1 }
0x10c7   :  { %1606 = vsyncpa [#allocation7 + $0x1], 1 }

</bundles_post_ra>
